<compile_context>
chip_gen: v7x
topology: tpu7x:2x2x1
jax: 0.10.0
libtpu: 0.0.40
codegen_flags: <defaults>
</compile_context>

<pallas_src>
import functools
import math

import numpy as np
import jax
import jax.numpy as jnp
from jax.experimental import pallas as pl
from jax.experimental.pallas import tpu as pltpu


_LANE = 128
_GELU_C = 0.7978845608028654  # sqrt(2/pi)


def _gelu_tanh(y):
    # TODO(synk): PyTorch nn.GELU() default is the exact erf form; the tanh
    # approximation (max abs err ~3e-4) is used since erf lowering in Mosaic
    # is not guaranteed.
    return 0.5 * y * (1.0 + jnp.tanh(_GELU_C * (y + 0.044715 * (y * y * y))))


def _round_up(x, m):
    return (x + m - 1) // m * m


# ----------------------------- fused kernel --------------------------------


def _e_mlp_kernel(H, W,
                  x_ref, w1_ref, b1_ref, wf1_ref, bc1_ref,
                  wf2_ref, bc2_ref, w2_ref, b2_ref,
                  rowi_ref, coli_ref, o_ref):
    """One image per grid step; everything stays in VMEM/registers.

    x_ref    : (1, H*W, Cp)   bf16   channel-padded input tokens
    w1_ref   : (Cp, Cep)      bf16
    b1_ref   : (1, Cep)       f32
    wf*_ref  : (9*Cep, Cep)   bf16   3x3 conv taps, im2col row order kh*3+kw
    bc*_ref  : (1, Cep)       f32
    w2_ref   : (Cep, Cp)      bf16
    b2_ref   : (1, Cp)        f32
    rowi/coli: (H*W, 1)       int32  per-token spatial row / col index
    o_ref    : (1, H*W, Cp)   caller dtype
    """
    HW = H * W
    f32 = jnp.float32
    bf16 = jnp.bfloat16

    # Boundary masks for conv padding=1, built once and reused by both convs
    # (tiny (HW, 1) vectors).
    row = rowi_ref[...]
    col = coli_ref[...]
    r_top = (row >= 1).astype(f32)        # neighbour (row-1, .) in bounds
    r_bot = (row <= H - 2).astype(f32)    # neighbour (row+1, .) in bounds
    c_lft = (col >= 1).astype(f32)
    c_rgt = (col <= W - 2).astype(f32)
    masks = (r_top * c_lft, r_top, r_top * c_rgt,
             c_lft,         None,  c_rgt,
             r_bot * c_lft, r_bot, r_bot * c_rgt)

    def conv3x3(h, wf_ref, b_ref):
        # im2col: the 9 shifted taps are produced with pltpu.roll on the
        # flattened (HW, Cep) slab (XLU shifts, no slice/reshape relayouts),
        # zero-masked at the image border (= conv padding), concatenated along
        # lanes, and consumed by ONE (HW, 9*Cep) @ (9*Cep, Cep) MXU matmul
        # with f32 accumulation.  Bias is added once on the full tile.
        patches = []
        for t in range(9):
            d = (t // 3 - 1) * W + (t % 3 - 1)        # flat offset of tap t
            p = h if d == 0 else pltpu.roll(h, shift=(-d) % HW, axis=0)
            if masks[t] is not None:
                p = p * masks[t]
            patches.append(p.astype(bf16))
        pm = jnp.concatenate(patches, axis=-1)        # (HW, 9*Cep) bf16
        return jnp.dot(pm, wf_ref[...], preferred_element_type=f32) + b_ref[...]

    # ---- linear1 + GELU (bf16 MXU, f32 accumulate + f32 epilogue) ----------
    y = jnp.dot(x_ref[0], w1_ref[...], preferred_element_type=f32) + b1_ref[...]
    y = _gelu_tanh(y)                                  # (HW, Cep) f32

    # 'b (h w) c -> b c h w' is a pure layout change: we keep channels-last on
    # the flattened (row-major) token axis, mathematically identical with
    # (kh, kw, Cin, Cout) conv taps.
    # NOTE: "depthwise_conv" in the PyTorch module has groups=1, i.e. it is a
    # full 3x3 conv -> implemented as such.
    h1 = conv3x3(y, wf1_ref, bc1_ref)                  # (HW, Cep) f32
    h2 = conv3x3(h1, wf2_ref, bc2_ref)                 # (HW, Cep) f32

    # ---- linear2 (single lane-dense store of the whole output tile) --------
    out = jnp.dot(h2.astype(bf16), w2_ref[...], preferred_element_type=f32)
    o_ref[0] = (out + b2_ref[...]).astype(o_ref.dtype)


# ----------------------------- wrapper --------------------------------------


def prepare_params(params):
    """Pad channel dims to lane (128) multiples and pre-cast MXU operands to
    bf16 ONCE, outside the per-call jit.  Zero-padded channels are
    mathematically inert through linear / GELU / conv / linear."""
    C, Ce = params["w1"].shape
    Cp, Cep = _round_up(C, _LANE), _round_up(Ce, _LANE)
    bf16, f32 = jnp.bfloat16, jnp.float32

    def pad_to(a, shape):
        return jnp.pad(a, [(0, t - s) for s, t in zip(a.shape, shape)])

    return dict(
        w1=pad_to(params["w1"], (Cp, Cep)).astype(bf16),
        b1=pad_to(params["b1"], (1, Cep)).astype(f32),
        wf1=pad_to(params["wc1"], (3, 3, Cep, Cep)).reshape(9 * Cep, Cep).astype(bf16),
        bc1=pad_to(params["bc1"], (1, Cep)).astype(f32),
        wf2=pad_to(params["wc2"], (3, 3, Cep, Cep)).reshape(9 * Cep, Cep).astype(bf16),
        bc2=pad_to(params["bc2"], (1, Cep)).astype(f32),
        w2=pad_to(params["w2"], (Cep, Cp)).astype(bf16),
        b2=pad_to(params["b2"], (1, Cp)).astype(f32),
    )


@jax.jit
def e_mlp_forward(x, prep):
    B, HW, C = x.shape
    H = int(round(math.sqrt(HW)))
    assert H * H == HW, "E_MLP requires a square token grid (hw == h*h)"
    W = H
    Cp, Cep = prep["w1"].shape
    out_dtype = x.dtype

    # Lane-pad the input channels only if needed (skip pad + output slice when
    # C is already a multiple of 128 — production channel counts usually are).
    xp = x if Cp == C else jnp.pad(x, ((0, 0), (0, 0), (0, Cp - C)))
    xp = xp.astype(jnp.bfloat16)

    # Per-token spatial indices (trace-time constants) used for the conv
    # zero-padding masks inside the kernel.
    flat = np.arange(HW, dtype=np.int32).reshape(HW, 1)
    rowi = jnp.asarray(flat // W)
    coli = jnp.asarray(flat % W)

    # VMEM budget: double-buffered weights + x/out blocks + live im2col / f32
    # activation temporaries.  Clamped to <= 56 MiB so the same constant is
    # safe on v7x (64 MiB physical VMEM); v5e/v6e (128 MiB) get headroom
    # automatically when the computed footprint grows.
    w_bytes = 2 * ((Cp * Cep + 2 * 9 * Cep * Cep + Cep * Cp) * 2
                   + (3 * Cep + Cp) * 4)
    io_bytes = 2 * HW * Cp * 2 + 2 * HW * Cp * out_dtype.itemsize
    live_bytes = HW * 9 * Cep * 2 + 3 * HW * Cep * 4 + 8 * HW * 4
    vmem_limit = int(min(56 << 20,
                         max(32 << 20,
                             int(1.25 * (w_bytes + io_bytes + live_bytes)))))

    out = pl.pallas_call(
        functools.partial(_e_mlp_kernel, H, W),
        out_shape=jax.ShapeDtypeStruct((B, HW, Cp), out_dtype),
        grid=(B,),
        in_specs=[
            pl.BlockSpec((1, HW, Cp), lambda b: (b, 0, 0)),       # x
            pl.BlockSpec((Cp, Cep), lambda b: (0, 0)),            # w1
            pl.BlockSpec((1, Cep), lambda b: (0, 0)),             # b1
            pl.BlockSpec((9 * Cep, Cep), lambda b: (0, 0)),       # conv1 taps
            pl.BlockSpec((1, Cep), lambda b: (0, 0)),             # conv1 bias
            pl.BlockSpec((9 * Cep, Cep), lambda b: (0, 0)),       # conv2 taps
            pl.BlockSpec((1, Cep), lambda b: (0, 0)),             # conv2 bias
            pl.BlockSpec((Cep, Cp), lambda b: (0, 0)),            # w2
            pl.BlockSpec((1, Cp), lambda b: (0, 0)),              # b2
            pl.BlockSpec((HW, 1), lambda b: (0, 0)),              # row index
            pl.BlockSpec((HW, 1), lambda b: (0, 0)),              # col index
        ],
        out_specs=pl.BlockSpec((1, HW, Cp), lambda b: (b, 0, 0)),
        compiler_params=pltpu.CompilerParams(
            dimension_semantics=("parallel",),     # feeds both TCs on v7x
            vmem_limit_bytes=vmem_limit,
        ),
    )(xp, prep["w1"], prep["b1"], prep["wf1"], prep["bc1"],
      prep["wf2"], prep["bc2"], prep["w2"], prep["b2"], rowi, coli)

    return out if Cp == C else out[:, :, :C]


# ----------------------------- params / reference ---------------------------


def init_params(key, feature_size, forward_expansion):
    ce = int(forward_expansion * feature_size)
    ks = jax.random.split(key, 8)
    s = 0.1
    # NOTE: the PyTorch module also defines self.feed_forward (and takes a
    # dropout arg), but neither is used in forward(); intentionally omitted.
    return dict(
        w1=jax.random.normal(ks[0], (feature_size, ce), jnp.float32) * s,
        b1=jax.random.normal(ks[1], (1, ce), jnp.float32) * s,
        wc1=jax.random.normal(ks[2], (3, 3, ce, ce), jnp.float32) * s,
        bc1=jax.random.normal(ks[3], (1, ce), jnp.float32) * s,
        wc2=jax.random.normal(ks[4], (3, 3, ce, ce), jnp.float32) * s,
        bc2=jax.random.normal(ks[5], (1, ce), jnp.float32) * s,
        w2=jax.random.normal(ks[6], (ce, feature_size), jnp.float32) * s,
        b2=jax.random.normal(ks[7], (1, feature_size), jnp.float32) * s,
    )


def e_mlp_reference(x, params):
    """Pure-JAX f32 reference (same math as the PyTorch module, NHWC layout)."""
    B, HW, C = x.shape
    Hs = int(round(math.sqrt(HW)))
    Ce = params["w1"].shape[1]
    y = x.reshape(B * HW, C) @ params["w1"] + params["b1"]
    y = _gelu_tanh(y)
    y = y.reshape(B, Hs, Hs, Ce)
    dn = ("NHWC", "HWIO", "NHWC")
    y = jax.lax.conv_general_dilated(y, params["wc1"], (1, 1), "SAME",
                                     dimension_numbers=dn)
    y = y + params["bc1"].reshape(1, 1, 1, Ce)
    y = jax.lax.conv_general_dilated(y, params["wc2"], (1, 1), "SAME",
                                     dimension_numbers=dn)
    y = y + params["bc2"].reshape(1, 1, 1, Ce)
    y = y.reshape(B * HW, Ce) @ params["w2"] + params["b2"]
    return y.reshape(B, HW, C)


if __name__ == "__main__":
    key = jax.random.PRNGKey(0)
    kx, kp = jax.random.split(key)

    B = 2
    H = W = 8                 # hw = 64 -> sqrt(hw) = 8
    feature_size = 4          # channel dim c
    forward_expansion = 2     # expanded channels = 8

    x = jax.random.normal(kx, (B, H * W, feature_size), jnp.float32)
    params = init_params(kp, feature_size, forward_expansion)
    prep = prepare_params(params)      # once, outside the jitted forward

    out = e_mlp_forward(x, prep)
    jax.block_until_ready(out)

    assert out.shape == (B, H * W, feature_size), out.shape
    assert bool(jnp.all(jnp.isfinite(out)))

    ref = e_mlp_reference(x, params)
    max_err = float(jnp.max(jnp.abs(out - ref)))
    assert max_err < 5e-2, f"mismatch vs reference: {max_err}"

    print("KERNEL_OK")
</pallas_src>

<mosaic_0001>
module attributes {stable_mosaic.version = 11 : i64} {
  func.func @_e_mlp_kernel(%arg0: i32, %arg1: memref<1x64x128xbf16, #tpu.memory_space<vmem>>, %arg2: memref<128x128xbf16, #tpu.memory_space<vmem>>, %arg3: memref<1x128xf32, #tpu.memory_space<vmem>>, %arg4: memref<1152x128xbf16, #tpu.memory_space<vmem>>, %arg5: memref<1x128xf32, #tpu.memory_space<vmem>>, %arg6: memref<1152x128xbf16, #tpu.memory_space<vmem>>, %arg7: memref<1x128xf32, #tpu.memory_space<vmem>>, %arg8: memref<128x128xbf16, #tpu.memory_space<vmem>>, %arg9: memref<1x128xf32, #tpu.memory_space<vmem>>, %arg10: memref<64x1xi32, #tpu.memory_space<vmem>>, %arg11: memref<64x1xi32, #tpu.memory_space<vmem>>, %arg12: memref<1x64x128xf32, #tpu.memory_space<vmem>>) attributes {dimension_semantics = [#tpu.dimension_semantics<parallel>], iteration_bounds = array<i64: 2>, scalar_prefetch = 0 : i64, scratch_operands = 0 : i64, tpu.core_type = #tpu.core_type<tc>, window_params = [{transform_indices = @transform_0, window_bounds = array<i64: 1, 64, 128>}, {pipeline_mode = #tpu.pipeline_mode<synchronous>, transform_indices = @transform_1, window_bounds = array<i64: 128, 128>}, {pipeline_mode = #tpu.pipeline_mode<synchronous>, transform_indices = @transform_2, window_bounds = array<i64: 1, 128>}, {pipeline_mode = #tpu.pipeline_mode<synchronous>, transform_indices = @transform_3, window_bounds = array<i64: 1152, 128>}, {pipeline_mode = #tpu.pipeline_mode<synchronous>, transform_indices = @transform_4, window_bounds = array<i64: 1, 128>}, {pipeline_mode = #tpu.pipeline_mode<synchronous>, transform_indices = @transform_5, window_bounds = array<i64: 1152, 128>}, {pipeline_mode = #tpu.pipeline_mode<synchronous>, transform_indices = @transform_6, window_bounds = array<i64: 1, 128>}, {pipeline_mode = #tpu.pipeline_mode<synchronous>, transform_indices = @transform_7, window_bounds = array<i64: 128, 128>}, {pipeline_mode = #tpu.pipeline_mode<synchronous>, transform_indices = @transform_8, window_bounds = array<i64: 1, 128>}, {pipeline_mode = #tpu.pipeline_mode<synchronous>, transform_indices = @transform_9, window_bounds = array<i64: 64, 1>}, {pipeline_mode = #tpu.pipeline_mode<synchronous>, transform_indices = @transform_10, window_bounds = array<i64: 64, 1>}, {transform_indices = @transform_11, window_bounds = array<i64: 1, 64, 128>}]} {
    %c0 = arith.constant 0 : index
    %c0_0 = arith.constant 0 : index
    %0 = vector.load %arg10[%c0, %c0_0] : memref<64x1xi32, #tpu.memory_space<vmem>>, vector<64x1xi32>
    %c0_1 = arith.constant 0 : index
    %c0_2 = arith.constant 0 : index
    %1 = vector.load %arg11[%c0_1, %c0_2] : memref<64x1xi32, #tpu.memory_space<vmem>>, vector<64x1xi32>
    %c1_i32 = arith.constant 1 : i32
    %2 = vector.broadcast %c1_i32 : i32 to vector<64x1xi32>
    %3 = arith.cmpi sge, %0, %2 : vector<64x1xi32>
    %4 = arith.extui %3 : vector<64x1xi1> to vector<64x1xi32>
    %5 = arith.sitofp %4 : vector<64x1xi32> to vector<64x1xf32>
    %c6_i32 = arith.constant 6 : i32
    %6 = vector.broadcast %c6_i32 : i32 to vector<64x1xi32>
    %7 = arith.cmpi sle, %0, %6 : vector<64x1xi32>
    %8 = arith.extui %7 : vector<64x1xi1> to vector<64x1xi32>
    %9 = arith.sitofp %8 : vector<64x1xi32> to vector<64x1xf32>
    %c1_i32_3 = arith.constant 1 : i32
    %10 = vector.broadcast %c1_i32_3 : i32 to vector<64x1xi32>
    %11 = arith.cmpi sge, %1, %10 : vector<64x1xi32>
    %12 = arith.extui %11 : vector<64x1xi1> to vector<64x1xi32>
    %13 = arith.sitofp %12 : vector<64x1xi32> to vector<64x1xf32>
    %c6_i32_4 = arith.constant 6 : i32
    %14 = vector.broadcast %c6_i32_4 : i32 to vector<64x1xi32>
    %15 = arith.cmpi sle, %1, %14 : vector<64x1xi32>
    %16 = arith.extui %15 : vector<64x1xi1> to vector<64x1xi32>
    %17 = arith.sitofp %16 : vector<64x1xi32> to vector<64x1xf32>
    %18 = arith.mulf %5, %13 : vector<64x1xf32>
    %19 = arith.mulf %5, %17 : vector<64x1xf32>
    %20 = arith.mulf %9, %13 : vector<64x1xf32>
    %21 = arith.mulf %9, %17 : vector<64x1xf32>
    %c0_5 = arith.constant 0 : index
    %c0_6 = arith.constant 0 : index
    %c0_7 = arith.constant 0 : index
    %22 = vector.load %arg1[%c0_5, %c0_6, %c0_7] : memref<1x64x128xbf16, #tpu.memory_space<vmem>>, vector<1x64x128xbf16>
    %23 = vector.shape_cast %22 : vector<1x64x128xbf16> to vector<64x128xbf16>
    %c0_8 = arith.constant 0 : index
    %c0_9 = arith.constant 0 : index
    %24 = vector.load %arg2[%c0_8, %c0_9] : memref<128x128xbf16, #tpu.memory_space<vmem>>, vector<128x128xbf16>
    %cst = arith.constant dense<0.000000e+00> : vector<64x128xf32>
    %25 = tpu.matmul %23, %24, %cst {dimension_numbers = #tpu.dot_dimension_numbers<[1], [0], [0], [1], [0, 0, 1, 1], [], []>} : vector<64x128xbf16>, vector<128x128xbf16>, vector<64x128xf32> -> vector<64x128xf32>
    %c0_10 = arith.constant 0 : index
    %c0_11 = arith.constant 0 : index
    %26 = vector.load %arg3[%c0_10, %c0_11] : memref<1x128xf32, #tpu.memory_space<vmem>>, vector<1x128xf32>
    %27 = vector.broadcast %26 : vector<1x128xf32> to vector<64x128xf32>
    %28 = arith.addf %25, %27 : vector<64x128xf32>
    %cst_12 = arith.constant 5.000000e-01 : f32
    %29 = vector.broadcast %cst_12 : f32 to vector<64x128xf32>
    %30 = arith.mulf %29, %28 : vector<64x128xf32>
    %31 = arith.mulf %28, %28 : vector<64x128xf32>
    %32 = arith.mulf %31, %28 : vector<64x128xf32>
    %cst_13 = arith.constant 4.471500e-02 : f32
    %33 = vector.broadcast %cst_13 : f32 to vector<64x128xf32>
    %34 = arith.mulf %33, %32 : vector<64x128xf32>
    %35 = arith.addf %28, %34 : vector<64x128xf32>
    %cst_14 = arith.constant 0.797884583 : f32
    %36 = vector.broadcast %cst_14 : f32 to vector<64x128xf32>
    %37 = arith.mulf %36, %35 : vector<64x128xf32>
    %38 = math.tanh %37 : vector<64x128xf32>
    %cst_15 = arith.constant 1.000000e+00 : f32
    %39 = vector.broadcast %cst_15 : f32 to vector<64x128xf32>
    %40 = arith.addf %39, %38 : vector<64x128xf32>
    %41 = arith.mulf %30, %40 : vector<64x128xf32>
    %c9_i32 = arith.constant 9 : i32
    %42 = tpu.dynamic_rotate %41 by %c9_i32 dim 0 : vector<64x128xf32>, i32 -> vector<64x128xf32>
    %43 = vector.broadcast %18 : vector<64x1xf32> to vector<64x128xf32>
    %44 = arith.mulf %42, %43 : vector<64x128xf32>
    %45 = arith.truncf %44 : vector<64x128xf32> to vector<64x128xbf16>
    %c8_i32 = arith.constant 8 : i32
    %46 = tpu.dynamic_rotate %41 by %c8_i32 dim 0 : vector<64x128xf32>, i32 -> vector<64x128xf32>
    %47 = vector.broadcast %5 : vector<64x1xf32> to vector<64x128xf32>
    %48 = arith.mulf %46, %47 : vector<64x128xf32>
    %49 = arith.truncf %48 : vector<64x128xf32> to vector<64x128xbf16>
    %c7_i32 = arith.constant 7 : i32
    %50 = tpu.dynamic_rotate %41 by %c7_i32 dim 0 : vector<64x128xf32>, i32 -> vector<64x128xf32>
    %51 = vector.broadcast %19 : vector<64x1xf32> to vector<64x128xf32>
    %52 = arith.mulf %50, %51 : vector<64x128xf32>
    %53 = arith.truncf %52 : vector<64x128xf32> to vector<64x128xbf16>
    %c1_i32_16 = arith.constant 1 : i32
    %54 = tpu.dynamic_rotate %41 by %c1_i32_16 dim 0 : vector<64x128xf32>, i32 -> vector<64x128xf32>
    %55 = vector.broadcast %13 : vector<64x1xf32> to vector<64x128xf32>
    %56 = arith.mulf %54, %55 : vector<64x128xf32>
    %57 = arith.truncf %56 : vector<64x128xf32> to vector<64x128xbf16>
    %58 = arith.truncf %41 : vector<64x128xf32> to vector<64x128xbf16>
    %c63_i32 = arith.constant 63 : i32
    %59 = tpu.dynamic_rotate %41 by %c63_i32 dim 0 : vector<64x128xf32>, i32 -> vector<64x128xf32>
    %60 = vector.broadcast %17 : vector<64x1xf32> to vector<64x128xf32>
    %61 = arith.mulf %59, %60 : vector<64x128xf32>
    %62 = arith.truncf %61 : vector<64x128xf32> to vector<64x128xbf16>
    %c57_i32 = arith.constant 57 : i32
    %63 = tpu.dynamic_rotate %41 by %c57_i32 dim 0 : vector<64x128xf32>, i32 -> vector<64x128xf32>
    %64 = vector.broadcast %20 : vector<64x1xf32> to vector<64x128xf32>
    %65 = arith.mulf %63, %64 : vector<64x128xf32>
    %66 = arith.truncf %65 : vector<64x128xf32> to vector<64x128xbf16>
    %c56_i32 = arith.constant 56 : i32
    %67 = tpu.dynamic_rotate %41 by %c56_i32 dim 0 : vector<64x128xf32>, i32 -> vector<64x128xf32>
    %68 = vector.broadcast %9 : vector<64x1xf32> to vector<64x128xf32>
    %69 = arith.mulf %67, %68 : vector<64x128xf32>
    %70 = arith.truncf %69 : vector<64x128xf32> to vector<64x128xbf16>
    %c55_i32 = arith.constant 55 : i32
    %71 = tpu.dynamic_rotate %41 by %c55_i32 dim 0 : vector<64x128xf32>, i32 -> vector<64x128xf32>
    %72 = vector.broadcast %21 : vector<64x1xf32> to vector<64x128xf32>
    %73 = arith.mulf %71, %72 : vector<64x128xf32>
    %74 = arith.truncf %73 : vector<64x128xf32> to vector<64x128xbf16>
    %75 = tpu.concatenate %45, %49, %53, %57, %58, %62, %66, %70, %74 in 1 : vector<64x128xbf16>, vector<64x128xbf16>, vector<64x128xbf16>, vector<64x128xbf16>, vector<64x128xbf16>, vector<64x128xbf16>, vector<64x128xbf16>, vector<64x128xbf16>, vector<64x128xbf16> -> vector<64x1152xbf16>
    %c0_17 = arith.constant 0 : index
    %c0_18 = arith.constant 0 : index
    %76 = vector.load %arg4[%c0_17, %c0_18] : memref<1152x128xbf16, #tpu.memory_space<vmem>>, vector<1152x128xbf16>
    %cst_19 = arith.constant dense<0.000000e+00> : vector<64x128xf32>
    %77 = tpu.matmul %75, %76, %cst_19 {dimension_numbers = #tpu.dot_dimension_numbers<[1], [0], [0], [1], [0, 0, 1, 1], [], []>} : vector<64x1152xbf16>, vector<1152x128xbf16>, vector<64x128xf32> -> vector<64x128xf32>
    %c0_20 = arith.constant 0 : index
    %c0_21 = arith.constant 0 : index
    %78 = vector.load %arg5[%c0_20, %c0_21] : memref<1x128xf32, #tpu.memory_space<vmem>>, vector<1x128xf32>
    %79 = vector.broadcast %78 : vector<1x128xf32> to vector<64x128xf32>
    %80 = arith.addf %77, %79 : vector<64x128xf32>
    %c9_i32_22 = arith.constant 9 : i32
    %81 = tpu.dynamic_rotate %80 by %c9_i32_22 dim 0 : vector<64x128xf32>, i32 -> vector<64x128xf32>
    %82 = vector.broadcast %18 : vector<64x1xf32> to vector<64x128xf32>
    %83 = arith.mulf %81, %82 : vector<64x128xf32>
    %84 = arith.truncf %83 : vector<64x128xf32> to vector<64x128xbf16>
    %c8_i32_23 = arith.constant 8 : i32
    %85 = tpu.dynamic_rotate %80 by %c8_i32_23 dim 0 : vector<64x128xf32>, i32 -> vector<64x128xf32>
    %86 = vector.broadcast %5 : vector<64x1xf32> to vector<64x128xf32>
    %87 = arith.mulf %85, %86 : vector<64x128xf32>
    %88 = arith.truncf %87 : vector<64x128xf32> to vector<64x128xbf16>
    %c7_i32_24 = arith.constant 7 : i32
    %89 = tpu.dynamic_rotate %80 by %c7_i32_24 dim 0 : vector<64x128xf32>, i32 -> vector<64x128xf32>
    %90 = vector.broadcast %19 : vector<64x1xf32> to vector<64x128xf32>
    %91 = arith.mulf %89, %90 : vector<64x128xf32>
    %92 = arith.truncf %91 : vector<64x128xf32> to vector<64x128xbf16>
    %c1_i32_25 = arith.constant 1 : i32
    %93 = tpu.dynamic_rotate %80 by %c1_i32_25 dim 0 : vector<64x128xf32>, i32 -> vector<64x128xf32>
    %94 = vector.broadcast %13 : vector<64x1xf32> to vector<64x128xf32>
    %95 = arith.mulf %93, %94 : vector<64x128xf32>
    %96 = arith.truncf %95 : vector<64x128xf32> to vector<64x128xbf16>
    %97 = arith.truncf %80 : vector<64x128xf32> to vector<64x128xbf16>
    %c63_i32_26 = arith.constant 63 : i32
    %98 = tpu.dynamic_rotate %80 by %c63_i32_26 dim 0 : vector<64x128xf32>, i32 -> vector<64x128xf32>
    %99 = vector.broadcast %17 : vector<64x1xf32> to vector<64x128xf32>
    %100 = arith.mulf %98, %99 : vector<64x128xf32>
    %101 = arith.truncf %100 : vector<64x128xf32> to vector<64x128xbf16>
    %c57_i32_27 = arith.constant 57 : i32
    %102 = tpu.dynamic_rotate %80 by %c57_i32_27 dim 0 : vector<64x128xf32>, i32 -> vector<64x128xf32>
    %103 = vector.broadcast %20 : vector<64x1xf32> to vector<64x128xf32>
    %104 = arith.mulf %102, %103 : vector<64x128xf32>
    %105 = arith.truncf %104 : vector<64x128xf32> to vector<64x128xbf16>
    %c56_i32_28 = arith.constant 56 : i32
    %106 = tpu.dynamic_rotate %80 by %c56_i32_28 dim 0 : vector<64x128xf32>, i32 -> vector<64x128xf32>
    %107 = vector.broadcast %9 : vector<64x1xf32> to vector<64x128xf32>
    %108 = arith.mulf %106, %107 : vector<64x128xf32>
    %109 = arith.truncf %108 : vector<64x128xf32> to vector<64x128xbf16>
    %c55_i32_29 = arith.constant 55 : i32
    %110 = tpu.dynamic_rotate %80 by %c55_i32_29 dim 0 : vector<64x128xf32>, i32 -> vector<64x128xf32>
    %111 = vector.broadcast %21 : vector<64x1xf32> to vector<64x128xf32>
    %112 = arith.mulf %110, %111 : vector<64x128xf32>
    %113 = arith.truncf %112 : vector<64x128xf32> to vector<64x128xbf16>
    %114 = tpu.concatenate %84, %88, %92, %96, %97, %101, %105, %109, %113 in 1 : vector<64x128xbf16>, vector<64x128xbf16>, vector<64x128xbf16>, vector<64x128xbf16>, vector<64x128xbf16>, vector<64x128xbf16>, vector<64x128xbf16>, vector<64x128xbf16>, vector<64x128xbf16> -> vector<64x1152xbf16>
    %c0_30 = arith.constant 0 : index
    %c0_31 = arith.constant 0 : index
    %115 = vector.load %arg6[%c0_30, %c0_31] : memref<1152x128xbf16, #tpu.memory_space<vmem>>, vector<1152x128xbf16>
    %cst_32 = arith.constant dense<0.000000e+00> : vector<64x128xf32>
    %116 = tpu.matmul %114, %115, %cst_32 {dimension_numbers = #tpu.dot_dimension_numbers<[1], [0], [0], [1], [0, 0, 1, 1], [], []>} : vector<64x1152xbf16>, vector<1152x128xbf16>, vector<64x128xf32> -> vector<64x128xf32>
    %c0_33 = arith.constant 0 : index
    %c0_34 = arith.constant 0 : index
    %117 = vector.load %arg7[%c0_33, %c0_34] : memref<1x128xf32, #tpu.memory_space<vmem>>, vector<1x128xf32>
    %118 = vector.broadcast %117 : vector<1x128xf32> to vector<64x128xf32>
    %119 = arith.addf %116, %118 : vector<64x128xf32>
    %120 = arith.truncf %119 : vector<64x128xf32> to vector<64x128xbf16>
    %c0_35 = arith.constant 0 : index
    %c0_36 = arith.constant 0 : index
    %121 = vector.load %arg8[%c0_35, %c0_36] : memref<128x128xbf16, #tpu.memory_space<vmem>>, vector<128x128xbf16>
    %cst_37 = arith.constant dense<0.000000e+00> : vector<64x128xf32>
    %122 = tpu.matmul %120, %121, %cst_37 {dimension_numbers = #tpu.dot_dimension_numbers<[1], [0], [0], [1], [0, 0, 1, 1], [], []>} : vector<64x128xbf16>, vector<128x128xbf16>, vector<64x128xf32> -> vector<64x128xf32>
    %c0_38 = arith.constant 0 : index
    %c0_39 = arith.constant 0 : index
    %123 = vector.load %arg9[%c0_38, %c0_39] : memref<1x128xf32, #tpu.memory_space<vmem>>, vector<1x128xf32>
    %124 = vector.broadcast %123 : vector<1x128xf32> to vector<64x128xf32>
    %125 = arith.addf %122, %124 : vector<64x128xf32>
    %c0_40 = arith.constant 0 : index
    %c0_41 = arith.constant 0 : index
    %c0_42 = arith.constant 0 : index
    %126 = vector.load %arg12[%c0_40, %c0_41, %c0_42] : memref<1x64x128xf32, #tpu.memory_space<vmem>>, vector<1x64x128xf32>
    %127 = vector.shape_cast %126 : vector<1x64x128xf32> to vector<64x128xf32>
    %128 = vector.shape_cast %125 : vector<64x128xf32> to vector<1x64x128xf32>
    tpu.vector_store %arg12[%c0_40, %c0_41, %c0_42], %128 {strides = array<i32>} : memref<1x64x128xf32, #tpu.memory_space<vmem>>, vector<1x64x128xf32>,
    return
  }
  func.func @transform_0(%arg0: i32) -> (i32, i32, i32) {
    %c0_i32 = arith.constant 0 : i32
    %c0_i32_0 = arith.constant 0 : i32
    %c0_i32_1 = arith.constant 0 : i32
    return %arg0, %c0_i32, %c0_i32_0 : i32, i32, i32
  }
  func.func @transform_1(%arg0: i32) -> (i32, i32) {
    %c0_i32 = arith.constant 0 : i32
    %c0_i32_0 = arith.constant 0 : i32
    %c0_i32_1 = arith.constant 0 : i32
    return %c0_i32, %c0_i32_0 : i32, i32
  }
  func.func @transform_2(%arg0: i32) -> (i32, i32) {
    %c0_i32 = arith.constant 0 : i32
    %c0_i32_0 = arith.constant 0 : i32
    %c0_i32_1 = arith.constant 0 : i32
    return %c0_i32, %c0_i32_0 : i32, i32
  }
  func.func @transform_3(%arg0: i32) -> (i32, i32) {
    %c0_i32 = arith.constant 0 : i32
    %c0_i32_0 = arith.constant 0 : i32
    %c0_i32_1 = arith.constant 0 : i32
    return %c0_i32, %c0_i32_0 : i32, i32
  }
  func.func @transform_4(%arg0: i32) -> (i32, i32) {
    %c0_i32 = arith.constant 0 : i32
    %c0_i32_0 = arith.constant 0 : i32
    %c0_i32_1 = arith.constant 0 : i32
    return %c0_i32, %c0_i32_0 : i32, i32
  }
  func.func @transform_5(%arg0: i32) -> (i32, i32) {
    %c0_i32 = arith.constant 0 : i32
    %c0_i32_0 = arith.constant 0 : i32
    %c0_i32_1 = arith.constant 0 : i32
    return %c0_i32, %c0_i32_0 : i32, i32
  }
  func.func @transform_6(%arg0: i32) -> (i32, i32) {
    %c0_i32 = arith.constant 0 : i32
    %c0_i32_0 = arith.constant 0 : i32
    %c0_i32_1 = arith.constant 0 : i32
    return %c0_i32, %c0_i32_0 : i32, i32
  }
  func.func @transform_7(%arg0: i32) -> (i32, i32) {
    %c0_i32 = arith.constant 0 : i32
    %c0_i32_0 = arith.constant 0 : i32
    %c0_i32_1 = arith.constant 0 : i32
    return %c0_i32, %c0_i32_0 : i32, i32
  }
  func.func @transform_8(%arg0: i32) -> (i32, i32) {
    %c0_i32 = arith.constant 0 : i32
    %c0_i32_0 = arith.constant 0 : i32
    %c0_i32_1 = arith.constant 0 : i32
    return %c0_i32, %c0_i32_0 : i32, i32
  }
  func.func @transform_9(%arg0: i32) -> (i32, i32) {
    %c0_i32 = arith.constant 0 : i32
    %c0_i32_0 = arith.constant 0 : i32
    %c0_i32_1 = arith.constant 0 : i32
    return %c0_i32, %c0_i32_0 : i32, i32
  }
  func.func @transform_10(%arg0: i32) -> (i32, i32) {
    %c0_i32 = arith.constant 0 : i32
    %c0_i32_0 = arith.constant 0 : i32
    %c0_i32_1 = arith.constant 0 : i32
    return %c0_i32, %c0_i32_0 : i32, i32
  }
  func.func @transform_11(%arg0: i32) -> (i32, i32, i32) {
    %c0_i32 = arith.constant 0 : i32
    %c0_i32_0 = arith.constant 0 : i32
    %c0_i32_1 = arith.constant 0 : i32
    return %arg0, %c0_i32, %c0_i32_0 : i32, i32, i32
  }
}

</mosaic_0001>

<bundles_post_ra>
// kernel: e_mlp_forward.1
= control target key start
LH: loop header
LB: loop body
LE: loop exit
PB: predicated region body
PF: predicated region fallthrough
CT: control target
= control target key end

     0   :  { %16 = vsyncpa [#allocation3], 0  ;;  %s6228_s0 = inlined_call_operand.vmem [shape: bf16[2,64,128], index: 0, kind: input, shape index: {}]   ;;  %s6229_s1 = inlined_call_operand.vmem [shape: bf16[128,128], index: 1, kind: input, shape index: {}]   ;;  %s6230_s2 = inlined_call_operand.vmem [shape: f32[1,128], index: 2, kind: input, shape index: {}]   ;;  %s6231_s3 = inlined_call_operand.hbm [shape: bf16[1152,128], index: 3, kind: input, shape index: {}]   ;;  %s6232_s4 = inlined_call_operand.vmem [shape: f32[1,128], index: 4, kind: input, shape index: {}]   ;;  %s6233_s5 = inlined_call_operand.hbm [shape: bf16[1152,128], index: 5, kind: input, shape index: {}]   ;;  %s6234_s6 = inlined_call_operand.vmem [shape: f32[1,128], index: 6, kind: input, shape index: {}]   ;;  %s6235_s7 = inlined_call_operand.vmem [shape: bf16[128,128], index: 7, kind: input, shape index: {}]   ;;  %s6236_s8 = inlined_call_operand.vmem [shape: f32[1,128], index: 8, kind: input, shape index: {}]   ;;  %s6237_s9 = inlined_call_operand.hbm [shape: s32[64,1], index: 9, kind: input, shape index: {}]   ;;  %s6238_s10 = inlined_call_operand.vmem [shape: s32[64,1], index: 10, kind: input, shape index: {}]   ;;  %s6239_s11 = inlined_call_operand.vmem [shape: f32[2,64,128], index: 11, kind: output, shape index: {}]  }
   0x1   :  { %17 = vsyncpa [#allocation5], 0  ;;  %s4613_s17 = smov 0  }
   0x2 LB: > { %s4619_s18 = sadd.s32 4294967295, %s4542_s17   ;;  %p3456_p0 = scmp.ge.s32.totalorder %s4542_s17, 1  ;;  %s4542_s17 = sphi %s4613_s17, %s23_s17  }
   0x3   : > { %p290_p1 = scmp.lt.s32.totalorder %s4542_s17, 3  ;;  %p4159_p2 = scmp.eq.s32.totalorder %s4619_s18, 0 }
   0x4   : > { %s4544_s20 = smov [#allocation4]   ;;  %s4545_s22 = smov [#allocation2]  }
   0x5   : > { %p4624_p3 = pnand %p3456_p0, %p290_p1  ;;  %s324_s21 = sshll.u32 %s4544_s20, 4  ;;  %s4628_s21 = int_to_ptr.vmem [resolvable:$true] %s324_s21 }
   0x6   : > { %s308_s23 = sshll.u32 %s4545_s22, 4  ;;  %s4546_s25 = smov [#allocation6]   ;;  %s4632_s23 = int_to_ptr.vmem [resolvable:$true] %s308_s23 }
   0x7   : > { %p4149_p4 = pneg %p4624_p3  ;;  %s346_s26 = sshll.u32 %s4546_s25, 4  ;;  %s4640_s26 = int_to_ptr.vmem [resolvable:$true] %s346_s26 }
   0x8   : > { %s4444_s29 = scalar_lea.hbm %s6233_s5, 9216 }
   0x9   : > { %p4636_p5 = pnand %p4159_p2, %p4149_p4  ;;  %p4445_p6 = scmp.ne.s32.totalorder %s6233_s5, %s4444_s29 }
   0xa   : > { %p4451_p10 = scmp.lt.u32.totalorder %s4444_s29, %s6233_s5 }
   0xb   : > { %p4650_p7 = pneg %p4636_p5 }
   0xd   : > { %p4447_p8 = pnand %p4650_p7, %p4445_p6 }
   0xf   : > { %p4448_p9 = pneg %p4447_p8 }
  0x11   : > { %p4453_p11 = pnand %p4451_p10, %p4448_p9 }
  0x13   : > { %4456 = shalt.err (!%p4453_p11)
}
  0x14   : > { %s4457_s16 = scalar_lea.vmem %s4628_s21, 9216  ;;  %p4465_p1 = scmp.lt.s32.totalorder %s4628_s21, %s4628_s21 }
  0x15   : > { %p4458_p12 = scmp.ne.s32.totalorder %s4628_s21, %s4457_s16  ;;  %p4466_p4 = scmp.lt.s32.totalorder %s4457_s16, %s4457_s16 }
  0x17   : > { %p4460_p13 = pnand %p4458_p12, %p4650_p7  ;;  %p4467_p6 = por %p4466_p4, %p4465_p1 }
  0x19   : > { %p4461_p0 = pneg %p4460_p13 }
  0x1b   : > { %p4468_p8 = pnand %p4467_p6, %p4461_p0 }
  0x1d   : > { %4471 = shalt.err (!%p4468_p8)
}
  0x1e   : > { %s4547_s20 = smov 64   ;;  %s4548_s22 = smov 4  }
  0x1f   : > { %4155 = dma.hbm_to_vmem [thread:$0]  (!%p4636_p5), %s6233_s5, 9216, %s4628_s21, [#allocation5], %s4547_s20, %s4547_s20, %s4548_s22  }
  0x20   : > { %s4472_s30 = scalar_lea.hbm %s6231_s3, 9216 }
  0x21   : > { %p4473_p9 = scmp.ne.s32.totalorder %s6231_s3, %s4472_s30  ;;  %p4479_p12 = scmp.lt.u32.totalorder %s4472_s30, %s6231_s3 }
  0x23   : > { %p4475_p10 = pnand %p4473_p9, %p4650_p7 }
  0x25   : > { %p4476_p11 = pneg %p4475_p10 }
  0x27   : > { %p4481_p13 = pnand %p4479_p12, %p4476_p11 }
  0x29   : > { %4484 = shalt.err (!%p4481_p13)
}
  0x2a   : > { %s4485_s21 = scalar_lea.vmem %s4632_s23, 9216  ;;  %p4493_p6 = scmp.lt.s32.totalorder %s4632_s23, %s4632_s23 }
  0x2b   : > { %p4486_p0 = scmp.ne.s32.totalorder %s4632_s23, %s4485_s21  ;;  %p4494_p8 = scmp.lt.s32.totalorder %s4485_s21, %s4485_s21 }
  0x2d   : > { %p4488_p1 = pnand %p4486_p0, %p4650_p7  ;;  %p4495_p9 = por %p4494_p8, %p4493_p6 }
  0x2f   : > { %p4489_p4 = pneg %p4488_p1 }
  0x31   : > { %p4496_p10 = pnand %p4495_p9, %p4489_p4 }
  0x33   : > { %4499 = shalt.err (!%p4496_p10)
}
  0x34   : > { %4152 = dma.hbm_to_vmem [thread:$0]  (!%p4636_p5), %s6231_s3, 9216, %s4632_s23, [#allocation3], %s4547_s20, %s4547_s20, %s4548_s22  }
  0x35   : > { %s4500_s30 = scalar_lea.hbm %s6237_s9, 1024 }
  0x36   : > { %p4501_p11 = scmp.ne.s32.totalorder %s6237_s9, %s4500_s30  ;;  %p4507_p0 = scmp.lt.u32.totalorder %s4500_s30, %s6237_s9 }
  0x38   : > { %p4503_p12 = pnand %p4501_p11, %p4650_p7 }
  0x3a   : > { %p4504_p13 = pneg %p4503_p12 }
  0x3c   : > { %p4509_p1 = pnand %p4507_p0, %p4504_p13 }
  0x3e   : > { %4512 = shalt.err (!%p4509_p1)
}
  0x3f   : > { %s4513_s23 = scalar_lea.vmem %s4640_s26, 1024  ;;  %p4521_p9 = scmp.lt.s32.totalorder %s4640_s26, %s4640_s26 }
  0x40   : > { %p4514_p4 = scmp.ne.s32.totalorder %s4640_s26, %s4513_s23  ;;  %p4522_p10 = scmp.lt.s32.totalorder %s4513_s23, %s4513_s23 }
  0x42   : > { %p4516_p6 = pnand %p4514_p4, %p4650_p7  ;;  %p4523_p11 = por %p4522_p10, %p4521_p9 }
  0x44   : > { %p4517_p8 = pneg %p4516_p6 }
  0x46   : > { %p4524_p12 = pnand %p4523_p11, %p4517_p8 }
  0x48   : > { %4527 = shalt.err (!%p4524_p12)
}
  0x49   : > { %s4549_s20 = smov 128   ;;  %s4550_s22 = smov 8  }
  0x4a   : > { %4158 = dma.hbm_to_vmem [thread:$0]  (!%p4636_p5), %s6237_s9, 1024, %s4640_s26, [#allocation5], %s4549_s20, %s4549_s20, %s4550_s22  }
  0x4b   : > { %373 = sbr.rel (%p4624_p3) target bundleno = 1194 (0x4aa), region = 64 }
  0x52   : > { %4533 = dma.done.wait (%p4159_p2), [#allocation3], 9216  }
  0x53   : > { %4535 = vsyncadd (%p4159_p2), [#allocation3], 4294958080 }
  0x54   : > { %4537 = dma.done.wait (%p4159_p2), [#allocation5], 10240  }
  0x55   : > { %4539 = vsyncadd (%p4159_p2), [#allocation5], 4294957056  ;;  %p421_p7 = scmp.lt.s32.totalorder %s4619_s18, 1  ;;  %v4551_v0 = vmov 0   ;;  %v4264_v1 = vld [vmem:[%s6229_s1] sm:$0xff]   ;;  %v4265_v2 = vld [vmem:[%s6229_s1 + $0x8] sm:$0xff]  }
  0x56   : > { %4188 = vset.pattern.permute.xlu1 %v4551_v0  ;;  %4182 = vset.pattern.permute.xlu0 %v4551_v0  ;;  %v4266_v3 = vld [vmem:[%s6229_s1 + $0x10] sm:$0xff]   ;;  %v4267_v4 = vld [vmem:[%s6229_s1 + $0x18] sm:$0xff]   ;;  %v4268_v6 = vld [vmem:[%s6229_s1 + $0x20] sm:$0xff]   ;;  %v4552_v12 = vmov 0.0  }
  0x57   : > { %s6572_s18 = smov (!%p421_p7, %s4619_s18), 1  ;;  %4041 = vmatprep.subr.bf16.mxu0 %v4264_v1  ;;  %v4753_v7 = vld [vmem:[#allocation6 + $0x10] sm:$0xff]  ;;  %v4755_v8 = vld [vmem:[#allocation6 + $0x18] sm:$0xff]  ;;  %v4757_v9 = vld [vmem:[#allocation6] sm:$0xff] }
  0x58   : > { %s3671_s27 = sshll.u32 %s6572_s18, 5  ;;  %4042 = vmatpush3.bf16.msra.mxu0 %v4264_v1  ;;  %vm450_vm0 = vcmp.ge.s32.totalorder %v4753_v7, 1  ;;  %vm451_vm1 = vcmp.ge.s32.totalorder %v4755_v8, 1  ;;  %v4761_v10 = vld [vmem:[#allocation6 + $0x8] sm:$0xff]  ;;  %vm448_vm2 = vcmp.ge.s32.totalorder %v4757_v9, 1  ;;  %v440_v15 = vld [vmem:[%s6238_s10] sm:$0xff] }
  0x59   : > { %4043 = vmatprep.subr.bf16.mxu0 %v4265_v2  ;;  %s4744_s14 = scalar_lea.vmem %s6228_s0, %s3671_s27  ;;  %v4766_v11 = vld [vmem:[%s6238_s10 + $0x8] sm:$0xff]  ;;  %v4769_v13 = vsel %vm450_vm0, 1.0, %v4552_v12  ;;  %v4772_v14 = vsel %vm451_vm1, 1.0, %v4552_v12  ;;  %vm449_vm3 = vcmp.ge.s32.totalorder %v4761_v10, 1  ;;  %v4782_v16 = vld [vmem:[%s6238_s10 + $0x18] sm:$0xff]  ;;  %v3469_v18 = vsel %vm448_vm2, 1.0, %v4552_v12 }
  0x5a   : > { %v4272_v5 = vld [vmem:[%s4744_s14] sm:$0xff]   ;;  %v4189_v17 = vpack.i.bf16 %v4772_v14, %v4769_v13  ;;  %v4788_v19 = vsel %vm449_vm3, 1.0, %v4552_v12  ;;  %v4269_v20 = vld [vmem:[%s6229_s1 + $0x28] sm:$0xff]   ;;  %vm497_vm4 = vcmp.ge.s32.totalorder %v4766_v11, 1  ;;  %vm496_vm5 = vcmp.ge.s32.totalorder %v440_v15, 1  ;;  %v442_v22 = vld [vmem:[%s6238_s10 + $0x10] sm:$0xff] }
  0x5b   : > { %4057 = vmatprep.mubr.bf16.mxu0 %v4272_v5  ;;  %v4183_v21 = vpack.i.bf16 %v4788_v19, %v3469_v18  ;;  %v4799_v23 = vsel %vm497_vm4, 1.0, %v4552_v12  ;;  %v4802_v24 = vsel %vm496_vm5, 1.0, %v4552_v12  ;;  %vm499_vm6 = vcmp.ge.s32.totalorder %v4782_v16, 1  ;;  %v4270_v25 = vld [vmem:[%s6229_s1 + $0x30] sm:$0xff]   ;;  %v4815_v29 = vld [vmem:[#allocation6 + $0x20] sm:$0xff]  ;;  %v4817_v30 = vld [vmem:[#allocation6 + $0x28] sm:$0xff] }
  0x5c   : > { %4044 = vmatpush3.bf16.msra.mxu0 %v4265_v2  ;;  %4190 = vperm.xlu1 %4188, %v4189_v17   ;;  %v545_v26 = vmul.f32 %v4799_v23, %v4788_v19  ;;  %v4194_v27 = vpack.i.bf16 %v4799_v23, %v4802_v24  ;;  %v4813_v28 = vsel %vm499_vm6, 1.0, %v4552_v12  ;;  %vm520_vm7 = vcmp.le.s32.totalorder %v440_v15, 6  ;;  %v445_v31 = vld [vmem:[%s6238_s10 + $0x28] sm:$0xff]  ;;  %v444_v32 = vld [vmem:[%s6238_s10 + $0x20] sm:$0xff]  ;;  %v4831_v36 = vld [vmem:[#allocation6 + $0x30] sm:$0xff]  ;;  %s3672_s30 = sshll.u32 %s6572_s18, 6 }
  0x5d   : > { %4045 = vmatprep.subr.bf16.mxu0 %v4266_v3  ;;  %4184 = vperm.xlu0 %4182, %v4183_v21   ;;  %vm498_vm8 = vcmp.ge.s32.totalorder %v442_v22, 1  ;;  %v547_v33 = vmul.f32 %v4813_v28, %v4772_v14  ;;  %v544_v34 = vmul.f32 %v4802_v24, %v3469_v18  ;;  %v4829_v35 = vsel %vm520_vm7, 1.0, %v4552_v12  ;;  %v4271_v37 = vld [vmem:[%s6229_s1 + $0x38] sm:$0xff]   ;;  %v446_v48 = vld [vmem:[%s6238_s10 + $0x30] sm:$0xff]  ;;  %v4273_v49 = vld [vmem:[%s4744_s14 + $0x8] sm:$0xff]   ;;  %s430_s20 = scalar_lea.vmem %s6239_s11, %s3672_s30 }
  0x5e   : > { %v4837_v38 = vsel %vm498_vm8, 1.0, %v4552_v12  ;;  %vm452_vm9 = vcmp.ge.s32.totalorder %v4815_v29, 1  ;;  %vm453_vm10 = vcmp.ge.s32.totalorder %v4817_v30, 1  ;;  %vm521_vm11 = vcmp.le.s32.totalorder %v4766_v11, 6  ;;  %v4842_v39 = vld [vmem:[#allocation6 + $0x38] sm:$0xff]  ;;  %v4274_v53 = vld [vmem:[%s4744_s14 + $0x10] sm:$0xff]  }
  0x5f   : > { %vm472_vm12 = vcmp.le.s32.totalorder %v4757_v9, 6  ;;  %vm501_vm13 = vcmp.ge.s32.totalorder %v445_v31, 1  ;;  %vm500_vm14 = vcmp.ge.s32.totalorder %v444_v32, 1  ;;  %vm474_vm15 = vcmp.le.s32.totalorder %v4753_v7, 6  ;;  %v447_v41 = vld [vmem:[%s6238_s10 + $0x38] sm:$0xff] }
  0x60   : > { %4046 = vmatpush3.bf16.msra.mxu0 %v4266_v3  ;;  %842 = vperm.xlu1 %4188, %v545_v26   ;;  %vm473_vm0 = vcmp.le.s32.totalorder %v4761_v10, 6  ;;  %v552_v40 = vmul.f32 %v4829_v35, %v3469_v18  ;;  %vm475_vm1 = vcmp.le.s32.totalorder %v4755_v8, 6  ;;  %v4853_v42 = vsel %vm452_vm9, 1.0, %v4552_v12 }
  0x61   : > { %4047 = vmatprep.subr.bf16.mxu0 %v4267_v4  ;;  %4195 = vperm.xlu0 %4182, %v4194_v27   ;;  %v4856_v43 = vsel %vm453_vm10, 1.0, %v4552_v12  ;;  %vm522_vm2 = vcmp.le.s32.totalorder %v442_v22, 6  ;;  %vm454_vm3 = vcmp.ge.s32.totalorder %v4831_v36, 1  ;;  %v546_v44 = vmul.f32 %v4837_v38, %v4769_v13 }
  0x62   : > { %v4864_v45 = vsel %vm521_vm11, 1.0, %v4552_v12  ;;  %v4868_v46 = vsel %vm501_vm13, 1.0, %v4552_v12  ;;  %v4872_v47 = vsel %vm500_vm14, 1.0, %v4552_v12  ;;  %vm455_vm4 = vcmp.ge.s32.totalorder %v4842_v39, 1 }
  0x63   : > { %vm523_vm5 = vcmp.le.s32.totalorder %v4782_v16, 6  ;;  %v4199_v50 = vpack.i.bf16 %v4856_v43, %v4853_v42  ;;  %v4883_v51 = vsel %vm522_vm2, 1.0, %v4552_v12  ;;  %v3475_v52 = vsel %vm454_vm3, 1.0, %v4552_v12 }
  0x64   : > { %4048 = vmatpush3.bf16.msra.mxu0 %v4267_v4  ;;  %852 = vperm.xlu1 %4188, %v547_v33   ;;  %vm503_vm6 = vcmp.ge.s32.totalorder %v447_v41, 1  ;;  %vm502_vm7 = vcmp.ge.s32.totalorder %v446_v48, 1  ;;  %vm524_vm8 = vcmp.le.s32.totalorder %v444_v32, 6  ;;  %vm525_vm9 = vcmp.le.s32.totalorder %v445_v31, 6  ;;  %v4275_v4 = vld [vmem:[%s4744_s14 + $0x18] sm:$0xff]  }
  0x65   : > { %4049 = vmatprep.subr.bf16.mxu0 %v4268_v6  ;;  %837 = vperm.xlu0 %4182, %v544_v34   ;;  %v553_v54 = vmul.f32 %v4864_v45, %v4788_v19  ;;  %v3476_v55 = vsel %vm455_vm4, 1.0, %v4552_v12  ;;  %v4891_v56 = vsel %vm523_vm5, 1.0, %v4552_v12  ;;  %vm526_vm10 = vcmp.le.s32.totalorder %v446_v48, 6  ;;  %v4278_v48 = vld [vmem:[#allocation2 + $0xc0] sm:$0xff]  }
  0x66   : > { %vm527_vm11 = vcmp.le.s32.totalorder %v447_v41, 6  ;;  %v4894_v57 = vsel %vm503_vm6, 1.0, %v4552_v12  ;;  %v4897_v58 = vsel %vm502_vm7, 1.0, %v4552_v12  ;;  %v4900_v59 = vsel %vm524_vm8, 1.0, %v4552_v12 }
  0x67   : > { %v4903_v60 = vsel %vm525_vm9, 1.0, %v4552_v12  ;;  %v549_v61 = vmul.f32 %v4868_v46, %v4856_v43  ;;  %v548_v62 = vmul.f32 %v4872_v47, %v4853_v42  ;;  %v4910_v63 = vsel %vm526_vm10, 1.0, %v4552_v12 }
  0x68   : > { %4050 = vmatpush3.bf16.msra.mxu0 %v4268_v6  ;;  %958 = vperm.xlu1 %4188, %v552_v40   ;;  %v4913_v0 = vsel %vm527_vm11, 1.0, %v4552_v12  ;;  %v4918_v1 = vsel %vm472_vm12, 1.0, %v4552_v12  ;;  %vm476_vm13 = vcmp.le.s32.totalorder %v4815_v29, 6  ;;  %v4924_v2 = vsel %vm473_vm0, 1.0, %v4552_v12 }
  0x69   : > { %4051 = vmatprep.subr.bf16.mxu0 %v4269_v20  ;;  %847 = vperm.xlu0 %4182, %v546_v44   ;;  %v4929_v3 = vsel %vm474_vm15, 1.0, %v4552_v12  ;;  %v554_v5 = vmul.f32 %v4883_v51, %v4769_v13  ;;  %v4937_v6 = vsel %vm475_vm1, 1.0, %v4552_v12  ;;  %vm477_vm12 = vcmp.le.s32.totalorder %v4817_v30, 6 }
  0x6a   : > { %v4941_v9 = vsel %vm476_vm13, 1.0, %v4552_v12  ;;  %v4944_v10 = vsel %vm477_vm12, 1.0, %v4552_v12  ;;  %vm478_vm14 = vcmp.le.s32.totalorder %v4831_v36, 6  ;;  %vm479_vm15 = vcmp.le.s32.totalorder %v4842_v39, 6 }
  0x6b   : > { %v4204_v7 = vpack.i.bf16 %v4813_v28, %v4837_v38  ;;  %v4951_v8 = vsel %vm478_vm14, 1.0, %v4552_v12  ;;  %v4954_v11 = vsel %vm479_vm15, 1.0, %v4552_v12  ;;  %v4209_v13 = vpack.i.bf16 %v3476_v55, %v3475_v52 }
  0x6c   : > { %4052 = vmatpush3.bf16.msra.mxu0 %v4269_v20  ;;  %4200 = vperm.xlu1 %4188, %v4199_v50   ;;  %v555_v15 = vmul.f32 %v4891_v56, %v4772_v14  ;;  %v551_v16 = vmul.f32 %v4894_v57, %v3476_v55  ;;  %v550_v17 = vmul.f32 %v4897_v58, %v3475_v52  ;;  %v4280_v50 = vld [vmem:[#allocation2 + $0x48] sm:$0xff]  }
  0x6d   : > { %4053 = vmatprep.subr.bf16.mxu0 %v4270_v25  ;;  %963 = vperm.xlu0 %4182, %v553_v54   ;;  %v556_v18 = vmul.f32 %v4900_v59, %v4853_v42  ;;  %v4214_v12 = vpack.i.bf16 %v4868_v46, %v4872_v47  ;;  %v4219_v19 = vpack.i.bf16 %v4864_v45, %v4829_v35  ;;  %v4284_v54 = vld [vmem:[#allocation2 + $0x50] sm:$0xff]  }
  0x6e   : > { %v557_v14 = vmul.f32 %v4903_v60, %v4856_v43  ;;  %v558_v20 = vmul.f32 %v4910_v63, %v3475_v52  ;;  %v4224_v21 = vpack.i.bf16 %v4894_v57, %v4897_v58  ;;  %v4229_v22 = vpack.i.bf16 %v4891_v56, %v4883_v51  ;;  %v4282_v52 = vld [vmem:[#allocation2 + $0xc8] sm:$0xff]  }
  0x6f   : > { %v560_v26 = vmul.f32 %v4802_v24, %v4918_v1  ;;  %v4234_v27 = vpack.i.bf16 %v4924_v2, %v4918_v1  ;;  %v4239_v29 = vpack.i.bf16 %v4903_v60, %v4900_v59  ;;  %v561_v30 = vmul.f32 %v4799_v23, %v4924_v2 }
  0x70   : > { %4054 = vmatpush3.bf16.msra.mxu0 %v4270_v25  ;;  %862 = vperm.xlu1 %4188, %v549_v61   ;;  %v559_v25 = vmul.f32 %v4913_v0, %v3476_v55  ;;  %v562_v31 = vmul.f32 %v4837_v38, %v4929_v3  ;;  %v4244_v24 = vpack.i.bf16 %v4937_v6, %v4929_v3  ;;  %v4285_v55 = vld [vmem:[#allocation2 + $0x10] sm:$0xff]   ;;  %v4290_v61 = vld [vmem:[#allocation2 + $0xd8] sm:$0xff]  }
  0x71   : > { %4055 = vmatprep.subr.bf16.mxu0 %v4271_v37  ;;  %857 = vperm.xlu0 %4182, %v548_v62   ;;  %v4249_v32 = vpack.i.bf16 %v4913_v0, %v4910_v63  ;;  %v563_v33 = vmul.f32 %v4813_v28, %v4937_v6  ;;  %v564_v23 = vmul.f32 %v4872_v47, %v4941_v9  ;;  %v4277_v47 = vld [vmem:[#allocation2] sm:$0xff]   ;;  %v4291_v62 = vld [vmem:[#allocation2 + $0x98] sm:$0xff]  }
  0x72   : > { %v4254_v34 = vpack.i.bf16 %v4944_v10, %v4941_v9  ;;  %v568_v36 = vmul.f32 %v4829_v35, %v4918_v1  ;;  %v570_v28 = vmul.f32 %v4883_v51, %v4929_v3  ;;  %v569_v38 = vmul.f32 %v4864_v45, %v4924_v2  ;;  %v4281_v51 = vld [vmem:[#allocation2 + $0x8] sm:$0xff]   ;;  %v4293_v1 = vld [vmem:[#allocation2 + $0x20] sm:$0xff]  }
  0x73   : > { %v4259_v39 = vpack.i.bf16 %v4954_v11, %v4951_v8  ;;  %v571_v35 = vmul.f32 %v4891_v56, %v4937_v6  ;;  %v567_v40 = vmul.f32 %v4894_v57, %v4954_v11  ;;  %v566_v41 = vmul.f32 %v4897_v58, %v4951_v8  ;;  %v4286_v56 = vld [vmem:[#allocation2 + $0xd0] sm:$0xff]   ;;  %v4288_v58 = vld [vmem:[#allocation2 + $0x58] sm:$0xff]   ;;  %v4294_v2 = vld [vmem:[#allocation2 + $0xe0] sm:$0xff]  }
  0x74   : > { %4056 = vmatpush3.bf16.msra.mxu0 %v4271_v37  ;;  %968 = vperm.xlu1 %4188, %v554_v5   ;;  %v565_v37 = vmul.f32 %v4868_v46, %v4944_v10  ;;  %v573_v42 = vmul.f32 %v4903_v60, %v4944_v10  ;;  %v572_v43 = vmul.f32 %v4900_v59, %v4941_v9  ;;  %v4276_v46 = vld [vmem:[#allocation2 + $0x40] sm:$0xff]   ;;  %v4287_v57 = vld [vmem:[#allocation2 + $0x90] sm:$0xff]   ;;  %v4289_v60 = vld [vmem:[#allocation2 + $0x18] sm:$0xff]  }
  0x75   : > { %4205 = vperm.xlu0 %4182, %v4204_v7   ;;  %v575_v44 = vmul.f32 %v4913_v0, %v4954_v11  ;;  %v574_v45 = vmul.f32 %v4910_v63, %v4951_v8  ;;  %3685 = vmatprep.subr.bf16.mxu1 %v4276_v46  ;;  %v4292_v63 = vld [vmem:[#allocation2 + $0x60] sm:$0xff]   ;;  %v4296_v5 = vld [vmem:[#allocation2 + $0x68] sm:$0xff]   ;;  %v4300_v8 = vld [vmem:[#allocation2 + $0x70] sm:$0xff]  }
  0x76   : > { %3686 = vmatpush3.bf16.msra.mxu1 %v4277_v47  ;;  %3725 = vmatprep.subr.bf16.mxu0 %v4278_v48  ;;  %v4295_v3 = vld [vmem:[#allocation2 + $0xa0] sm:$0xff]   ;;  %v4297_v6 = vld [vmem:[#allocation2 + $0x28] sm:$0xff]  }
  0x77   : > { %4058 = vmatmul.mubr.bf16.vlgmr.msra.gmra.mrb[0].mxu0 %v4273_v49  ;;  %v4279_v49 = vld [vmem:[#allocation2 + $0x80] sm:$0xff]   ;;  %3687 = vmatprep.subr.bf16.mxu1 %v4280_v50  ;;  %v4298_v9 = vld [vmem:[#allocation2 + $0xe8] sm:$0xff]  }
  0x78   : > { %4061 = vmatprep.mubr.bf16.mxu0 %v4274_v53  ;;  %4210 = vperm.xlu1 %4188, %v4209_v13   ;;  %v4283_v53 = vld [vmem:[#allocation2 + $0x88] sm:$0xff]   ;;  %v4301_v13 = vld [vmem:[#allocation2 + $0x30] sm:$0xff]   ;;  %v3501_v50 = vld [vmem:[%s6230_s2] ss:$0 sm:$0xff] }
  0x79   : > { %973 = vperm.xlu0 %4182, %v555_v15   ;;  %3726 = vmatpush3.bf16.msra.mxu0 %v4279_v49  ;;  %v4299_v7 = vld [vmem:[#allocation2 + $0xa8] sm:$0xff]   ;;  %v4302_v15 = vld [vmem:[#allocation2 + $0xf0] sm:$0xff]  }
  0x7a   : > { %3688 = vmatpush3.bf16.msra.mxu1 %v4281_v51  ;;  %3727 = vmatprep.subr.bf16.mxu0 %v4282_v52 }
  0x7b   : > { %3689 = vmatprep.subr.bf16.mxu1 %v4284_v54 }
  0x7c   : > { %872 = vperm.xlu1 %4188, %v551_v16   ;;  %v4303_v16 = vld [vmem:[#allocation2 + $0xb0] sm:$0xff]  }
  0x7d   : > { %867 = vperm.xlu0 %4182, %v550_v17   ;;  %3728 = vmatpush3.bf16.msra.mxu0 %v4283_v53 }
  0x7e   : > { %3690 = vmatpush3.bf16.msra.mxu1 %v4285_v55  ;;  %3729 = vmatprep.subr.bf16.mxu0 %v4286_v56 }
  0x7f   : > { %4062 = vmatmul.mubr.bf16.gmra.mrb[4].mxu0 %v4275_v4  ;;  %3691 = vmatprep.subr.bf16.mxu1 %v4288_v58 }
  0x80   : > { %978 = vperm.xlu1 %4188, %v556_v18   ;;  %v4304_v18 = vld [vmem:[#allocation2 + $0x78] sm:$0xff]  }
  0x81   : > { %4215 = vperm.xlu0 %4182, %v4214_v12   ;;  %3730 = vmatpush3.bf16.msra.mxu0 %v4287_v57  ;;  %v4305_v12 = vld [vmem:[#allocation2 + $0x38] sm:$0xff]  }
  0x82   : > { %3692 = vmatpush3.bf16.msra.mxu1 %v4289_v60  ;;  %3731 = vmatprep.subr.bf16.mxu0 %v4290_v61 }
  0x83   : > { %3693 = vmatprep.subr.bf16.mxu1 %v4292_v63 }
  0x84   : > { %4220 = vperm.xlu1 %4188, %v4219_v19  }
  0x85   : > { %983 = vperm.xlu0 %4182, %v557_v14   ;;  %3732 = vmatpush3.bf16.msra.mxu0 %v4291_v62  ;;  %v4306_v14 = vld [vmem:[#allocation2 + $0xf8] sm:$0xff]  }
  0x86   : > { %3694 = vmatpush3.bf16.msra.mxu1 %v4293_v1  ;;  %3733 = vmatprep.subr.bf16.mxu0 %v4294_v2  ;;  %v824_v1 = vlaneseq }
  0x87   : > { %3695 = vmatprep.subr.bf16.mxu1 %v4296_v5 }
  0x88   : > { %988 = vperm.xlu1 %4188, %v558_v20   ;;  %v4307_v20 = vld [vmem:[#allocation2 + $0xb8] sm:$0xff]  }
  0x89   : > { %4225 = vperm.xlu0 %4182, %v4224_v21   ;;  %3734 = vmatpush3.bf16.msra.mxu0 %v4295_v3  ;;  %v4308_v21 = vld [vmem:[#allocation2 + $0x140] sm:$0xff]  }
  0x8a   : > { %3696 = vmatpush3.bf16.msra.mxu1 %v4297_v6  ;;  %3735 = vmatprep.subr.bf16.mxu0 %v4298_v9 }
  0x8b   : > { %3697 = vmatprep.subr.bf16.mxu1 %v4300_v8 }
  0x8c   : > { %4230 = vperm.xlu1 %4188, %v4229_v22  }
  0x8d   : > { %993 = vperm.xlu0 %4182, %v559_v25   ;;  %3736 = vmatpush3.bf16.msra.mxu0 %v4299_v7  ;;  %v4310_v25 = vld [vmem:[#allocation2 + $0x1c0] sm:$0xff]  }
  0x8e   : > { %3698 = vmatpush3.bf16.msra.mxu1 %v4301_v13  ;;  %3737 = vmatprep.subr.bf16.mxu0 %v4302_v15 }
  0x8f   : > { %3699 = vmatprep.subr.bf16.mxu1 %v4304_v18 }
  0x90   : > { %1118 = vperm.xlu1 %4188, %v560_v26  }
  0x91   : > { %4235 = vperm.xlu0 %4182, %v4234_v27   ;;  %3738 = vmatpush3.bf16.msra.mxu0 %v4303_v16 }
  0x92   : > { %3700 = vmatpush3.bf16.msra.mxu1 %v4305_v12  ;;  %3739 = vmatprep.subr.bf16.mxu0 %v4306_v14 }
  0x93   : > { %3765 = vmatprep.subr.bf16.mxu1 %v4308_v21 }
  0x94   : > { %4240 = vperm.xlu1 %4188, %v4239_v29  }
  0x95   : > { %1123 = vperm.xlu0 %4182, %v561_v30   ;;  %3740 = vmatpush3.bf16.msra.mxu0 %v4307_v20  ;;  %v5119_v20 = vshrl.u32 %v824_v1, 7 }
  0x96   : > { %3805 = vmatprep.subr.bf16.mxu0 %v4310_v25 }
  0x97   : > { %6358 = vst [vmem:[#allocation43_spill] sm:$0xff] %v5119_v20  ;;  %vm947_vm0 = vcmp.lt.s32.totalorder %v5119_v20, 7  ;;  %vm826_vm1 = vcmp.lt.s32.totalorder %v5119_v20, 1 }
  0x98   : > { %1128 = vperm.xlu1 %4188, %v562_v31  }
  0x99   : > { %4245 = vperm.xlu0 %4182, %v4244_v24  }
  0x9c   : > { %4250 = vperm.xlu1 %4188, %v4249_v32  }
  0x9d   : > { %1133 = vperm.xlu0 %4182, %v563_v33  }
  0xa0   : > { %1138 = vperm.xlu1 %4188, %v564_v23  }
  0xa1   : > { %4255 = vperm.xlu0 %4182, %v4254_v34  }
  0xa4   : > { %1222 = vperm.xlu1 %4188, %v568_v36  }
  0xa5   : > { %1143 = vperm.xlu0 %4182, %v565_v37  }
  0xa8   : > { %1232 = vperm.xlu1 %4188, %v570_v28  }
  0xa9   : > { %1227 = vperm.xlu0 %4182, %v569_v38  }
  0xac   : > { %4260 = vperm.xlu1 %4188, %v4259_v39  }
  0xad   : > { %1237 = vperm.xlu0 %4182, %v571_v35  }
  0xb0   : > { %1153 = vperm.xlu1 %4188, %v567_v40  }
  0xb1   : > { %1148 = vperm.xlu0 %4182, %v566_v41  }
  0xb4   : > { %1247 = vperm.xlu1 %4188, %v573_v42  }
  0xb5   : > { %1242 = vperm.xlu0 %4182, %v572_v43  }
  0xb8   : > { %1257 = vperm.xlu1 %4188, %v575_v44  }
  0xb9   : > { %1252 = vperm.xlu0 %4182, %v574_v45  }
  0xdb   : > { %v5018_v59 = vpop.permute.xlu1 %4190 }
  0xdc   : > { %6324 = vst [vmem:[#allocation9_spill] sm:$0xff] %v5018_v59  ;;  %v5022_v4 = vpop.permute.xlu0 %4184 }
  0xdd   : > { %6326 = vst [vmem:[#allocation11_spill] sm:$0xff] %v5022_v4 }
  0xdf   : > { %v5020_v0 = vpop.permute.xlu1 %842 }
  0xe0   : > { %6325 = vst [vmem:[#allocation10_spill] sm:$0xff] %v5020_v0  ;;  %v5026_v11 = vpop.permute.xlu0 %4195 }
  0xe1   : > { %6328 = vst [vmem:[#allocation13_spill] sm:$0xff] %v5026_v11 }
  0xe3   : > { %v5024_v10 = vpop.permute.xlu1 %852 }
  0xe4   : > { %6327 = vst [vmem:[#allocation12_spill] sm:$0xff] %v5024_v10  ;;  %v5030_v19 = vpop.permute.xlu0 %837 }
  0xe5   : > { %6330 = vst [vmem:[#allocation15_spill] sm:$0xff] %v5030_v19 }
  0xe7   : > { %v5028_v17 = vpop.permute.xlu1 %958 }
  0xe8   : > { %6329 = vst [vmem:[#allocation14_spill] sm:$0xff] %v5028_v17  ;;  %v5034_v26 = vpop.permute.xlu0 %847 }
  0xe9   : > { %6332 = vst [vmem:[#allocation17_spill] sm:$0xff] %v5034_v26 }
  0xeb   : > { %v5032_v22 = vpop.permute.xlu1 %4200 }
  0xec   : > { %6331 = vst [vmem:[#allocation16_spill] sm:$0xff] %v5032_v22  ;;  %v5038_v29 = vpop.permute.xlu0 %963 }
  0xed   : > { %6334 = vst [vmem:[#allocation19_spill] sm:$0xff] %v5038_v29 }
  0xef   : > { %v5036_v27 = vpop.permute.xlu1 %862 }
  0xf0   : > { %6333 = vst [vmem:[#allocation18_spill] sm:$0xff] %v5036_v27  ;;  %v5042_v31 = vpop.permute.xlu0 %857 }
  0xf1   : > { %6336 = vst [vmem:[#allocation21_spill] sm:$0xff] %v5042_v31 }
  0xf3   : > { %v5040_v30 = vpop.permute.xlu1 %968 }
  0xf4   : > { %6335 = vst [vmem:[#allocation20_spill] sm:$0xff] %v5040_v30  ;;  %v5046_v32 = vpop.permute.xlu0 %4205 }
  0xf5   : > { %6338 = vst [vmem:[#allocation23_spill] sm:$0xff] %v5046_v32 }
  0xf7   : > { %v5044_v24 = vpop.permute.xlu1 %4210 }
  0xf8   : > { %6337 = vst [vmem:[#allocation22_spill] sm:$0xff] %v5044_v24  ;;  %v5050_v23 = vpop.permute.xlu0 %973 }
  0xf9   : > { %6340 = vst [vmem:[#allocation25_spill] sm:$0xff] %v5050_v23 }
  0xfb   : > { %v5048_v33 = vpop.permute.xlu1 %872 }
  0xfc   : > { %6339 = vst [vmem:[#allocation24_spill] sm:$0xff] %v5048_v33  ;;  %v5054_v36 = vpop.permute.xlu0 %867 }
  0xfd   : > { %6342 = vst [vmem:[#allocation27_spill] sm:$0xff] %v5054_v36 }
  0xff   : > { %v5052_v34 = vpop.permute.xlu1 %978 }
 0x100   : > { %6341 = vst [vmem:[#allocation26_spill] sm:$0xff] %v5052_v34  ;;  %v5058_v28 = vpop.permute.xlu0 %4215 }
 0x101   : > { %6344 = vst [vmem:[#allocation29_spill] sm:$0xff] %v5058_v28 }
 0x103   : > { %v5056_v37 = vpop.permute.xlu1 %4220 }
 0x104   : > { %6343 = vst [vmem:[#allocation28_spill] sm:$0xff] %v5056_v37  ;;  %v5062_v39 = vpop.permute.xlu0 %983 }
 0x105   : > { %6346 = vst [vmem:[#allocation31_spill] sm:$0xff] %v5062_v39 }
 0x107   : > { %v5060_v38 = vpop.permute.xlu1 %988 }
 0x108   : > { %6345 = vst [vmem:[#allocation30_spill] sm:$0xff] %v5060_v38  ;;  %v5066_v40 = vpop.permute.xlu0 %4225 }
 0x109   : > { %6348 = vst [vmem:[#allocation33_spill] sm:$0xff] %v5066_v40 }
 0x10b   : > { %v5064_v35 = vpop.permute.xlu1 %4230 }
 0x10c   : > { %6347 = vst [vmem:[#allocation32_spill] sm:$0xff] %v5064_v35  ;;  %v5070_v42 = vpop.permute.xlu0 %993 }
 0x10d   : > { %6350 = vst [vmem:[#allocation35_spill] sm:$0xff] %v5070_v42 }
 0x10f   : > { %v5068_v41 = vpop.permute.xlu1 %1118 }
 0x110   : > { %6349 = vst [vmem:[#allocation34_spill] sm:$0xff] %v5068_v41  ;;  %v5074_v44 = vpop.permute.xlu0 %4235 }
 0x111   : > { %6351 = vst [vmem:[#allocation36_spill] sm:$0xff] %v5074_v44 }
 0x113   : > { %v5072_v43 = vpop.permute.xlu1 %4240 }
 0x114   : > { %v5078_v46 = vpop.permute.xlu0 %1123 }
 0x115   : > { %6353 = vst [vmem:[#allocation38_spill] sm:$0xff] %v5078_v46 }
 0x117   : > { %v5076_v45 = vpop.permute.xlu1 %1128 }
 0x118   : > { %6352 = vst [vmem:[#allocation37_spill] sm:$0xff] %v5076_v45  ;;  %v5082_v48 = vpop.permute.xlu0 %4245 }
 0x11b   : > { %v5080_v47 = vpop.permute.xlu1 %4250 }
 0x11c   : > { %v5089_v52 = vpop.permute.xlu0 %1133 }
 0x11d   : > { %6355 = vst [vmem:[#allocation40_spill] sm:$0xff] %v5089_v52 }
 0x11f   : > { %v5084_v49 = vpop.permute.xlu1 %1138 }
 0x120   : > { %6354 = vst [vmem:[#allocation39_spill] sm:$0xff] %v5084_v49  ;;  %v5114_v13 = vpop.permute.xlu0 %4255 }
 0x121   : > { %6357 = vst [vmem:[#allocation42_spill] sm:$0xff] %v5114_v13 }
 0x123   : > { %v5099_v61 = vpop.permute.xlu1 %1222 }
 0x124   : > { %6356 = vst [vmem:[#allocation41_spill] sm:$0xff] %v5099_v61 }
 0x14a   : > { %v4059_v51 = vpop.f32.mrb[0].mxu0 }
 0x14b   : > { %v5091_v53 = vadd.f32 %v4059_v51, %v3501_v50  ;;  %v713_v54 = vpop.f32.mrb[1].mxu0 }
 0x14c   : > { %v5093_v55 = vadd.f32 %v3501_v50, %v713_v54  ;;  %v4060_v56 = vpop.f32.mrb[2].mxu0 }
 0x14d   : > { %v754_v57 = vmul.f32 %v5091_v53, %v5091_v53  ;;  %v5097_v58 = vadd.f32 %v4060_v56, %v3501_v50  ;;  %v716_v60 = vpop.f32.mrb[3].mxu0 }
 0x14e   : > { %v752_v62 = vmul.f32 %v5093_v55, %v5093_v55  ;;  %v5103_v63 = vadd.f32 %v3501_v50, %v716_v60 }
 0x14f   : > { %v762_v2 = vmul.f32 %v754_v57, %v5091_v53  ;;  %v755_v3 = vmul.f32 %v5097_v58, %v5097_v58 }
 0x150   : > { %v760_v6 = vmul.f32 %v752_v62, %v5093_v55  ;;  %v753_v9 = vmul.f32 %v5103_v63, %v5103_v63 }
 0x151   : > { %v770_v15 = vmul.f32 0.044715, %v762_v2  ;;  %v763_v16 = vmul.f32 %v755_v3, %v5097_v58  ;;  %v5127_v3 = vpop.permute.xlu1 %1232 }
 0x152   : > { %v768_v12 = vmul.f32 0.044715, %v760_v6  ;;  %v761_v14 = vmul.f32 %v753_v9, %v5103_v63  ;;  %v4063_v21 = vpop.f32.mrb[4].mxu0  ;;  %6359 = vst [vmem:[#allocation44_spill] sm:$0xff] %v5127_v3 }
 0x153   : > { %v778_v51 = vadd.f32 %v770_v15, %v5091_v53  ;;  %v771_v54 = vmul.f32 0.044715, %v763_v16  ;;  %v5123_v56 = vadd.f32 %v4063_v21, %v3501_v50  ;;  %v729_v57 = vpop.f32.mrb[5].mxu0 }
 0x154   : > { %v776_v62 = vadd.f32 %v768_v12, %v5093_v55  ;;  %v769_v2 = vmul.f32 0.044715, %v761_v14  ;;  %v5129_v6 = vadd.f32 %v3501_v50, %v729_v57  ;;  %v4064_v1 = vpop.f32.mrb[6].mxu0  ;;  %v5139_v57 = vpop.permute.xlu0 %1143 }
 0x155   : > { %v786_v18 = vmul.f32 0.7978846, %v778_v51  ;;  %v779_v25 = vadd.f32 %v771_v54, %v5097_v58  ;;  %v758_v15 = vmul.f32 %v5123_v56, %v5123_v56  ;;  %v732_v16 = vpop.f32.mrb[7].mxu0  ;;  %6360 = vst [vmem:[#allocation45_spill] sm:$0xff] %v5139_v57  ;;  %v5142_v9 = vadd.f32 %v4064_v1, %v3501_v50 }
 0x156   : > { %v784_v60 = vmul.f32 0.7978846, %v776_v62  ;;  %v777_v12 = vadd.f32 %v769_v2, %v5103_v63  ;;  %v756_v14 = vmul.f32 %v5129_v6, %v5129_v6  ;;  %v733_v5 = vadd.f32 %v3501_v50, %v732_v16 }
 0x157   : > { %4428 = vtanh.f32 %v786_v18  ;;  %v787_v7 = vmul.f32 0.7978846, %v779_v25  ;;  %v766_v51 = vmul.f32 %v758_v15, %v5123_v56  ;;  %v759_v21 = vmul.f32 %v5142_v9, %v5142_v9  ;;  %v5149_v25 = vpop.permute.xlu1 %4260 }
 0x158   : > { %4430 = vtanh.f32 %v784_v60  ;;  %v785_v54 = vmul.f32 0.7978846, %v777_v12  ;;  %v764_v8 = vmul.f32 %v756_v14, %v5129_v6  ;;  %6361 = vst [vmem:[#allocation46_spill] sm:$0xff] %v5149_v25  ;;  %v757_v1 = vmul.f32 %v733_v5, %v733_v5  ;;  %v5160_v18 = vpop.permute.xlu0 %1227 }
 0x159   : > { %4432 = vtanh.f32 %v787_v7  ;;  %v774_v2 = vmul.f32 0.044715, %v766_v51  ;;  %v767_v16 = vmul.f32 %v759_v21, %v5142_v9  ;;  %6362 = vst [vmem:[#allocation47_spill] sm:$0xff] %v5160_v18  ;;  %v746_v7 = vmul.f32 0.5, %v5091_v53 }
 0x15a   : > { %4434 = vtanh.f32 %v785_v54  ;;  %v772_v15 = vmul.f32 0.044715, %v764_v8  ;;  %v765_v62 = vmul.f32 %v757_v1, %v733_v5  ;;  %v744_v12 = vmul.f32 0.5, %v5093_v55 }
 0x15b   : > { %v782_v50 = vadd.f32 %v774_v2, %v5123_v56  ;;  %v775_v57 = vmul.f32 0.044715, %v767_v16  ;;  %v5171_v54 = vpop.permute.xlu1 %1153  ;;  %v747_v8 = vmul.f32 0.5, %v5097_v58  ;;  %v750_v52 = vmul.f32 0.5, %v5123_v56 }
 0x15c   : > { %v780_v51 = vadd.f32 %v772_v15, %v5129_v6  ;;  %v773_v49 = vmul.f32 0.044715, %v765_v62  ;;  %6363 = vst [vmem:[#allocation48_spill] sm:$0xff] %v5171_v54  ;;  %v5180_v45 = vpop.permute.xlu0 %1237 }
 0x15d   : > { %v790_v60 = vmul.f32 0.7978846, %v782_v50  ;;  %v783_v15 = vadd.f32 %v775_v57, %v5142_v9  ;;  %6364 = vst [vmem:[#allocation49_spill] sm:$0xff] %v5180_v45 }
 0x15e   : > { %v788_v21 = vmul.f32 0.7978846, %v780_v51  ;;  %v781_v16 = vadd.f32 %v773_v49, %v733_v5  ;;  %v745_v49 = vmul.f32 0.5, %v5103_v63 }
 0x15f   : > { %4436 = vtanh.f32 %v790_v60  ;;  %v791_v60 = vmul.f32 0.7978846, %v783_v15  ;;  %v5191_v56 = vpop.permute.xlu1 %1247  ;;  %v6429_v20 = vld [vmem:[#allocation46_spill] sm:$0xff] }
 0x160   : > { %4438 = vtanh.f32 %v788_v21  ;;  %v789_v1 = vmul.f32 0.7978846, %v781_v16  ;;  %v751_v16 = vmul.f32 0.5, %v5142_v9  ;;  %6367 = vst [vmem:[#allocation52_spill] sm:$0xff] %v5191_v56 }
 0x161   : > { %v4429_v62 = vpop.eup %4428  ;;  %4440 = vtanh.f32 %v791_v60 }
 0x162   : > { %v4431_v2 = vpop.eup %4430  ;;  %v802_v57 = vadd.f32 1.0, %v4429_v62  ;;  %v748_v62 = vmul.f32 0.5, %v5129_v6  ;;  %4442 = vtanh.f32 %v789_v1 }
 0x163   : > { %v4433_v50 = vpop.eup %4432  ;;  %v800_v21 = vadd.f32 1.0, %v4431_v2  ;;  %v749_v2 = vmul.f32 0.5, %v733_v5 }
 0x164   : > { %v4435_v53 = vpop.eup %4434  ;;  %v5182_v51 = vmul.f32 %v802_v57, %v746_v7  ;;  %v803_v15 = vadd.f32 1.0, %v4433_v50  ;;  %v6368_v7 = vunpack.i.h.bf16 %v5018_v59  ;;  %v6372_v57 = vunpack.i.h.bf16 %v5022_v4 }
 0x165   : > { %v5185_v55 = vmul.f32 %v800_v21, %v744_v12  ;;  %v801_v58 = vadd.f32 1.0, %v4435_v53  ;;  %v6370_v12 = vunpack.i.h.bf16 %v5149_v25  ;;  %v6375_v50 = vunpack.i.l.bf16 %v5018_v59 }
 0x166   : > { %6365 = vst [vmem:[#allocation50_spill] sm:$0xff] %v5182_v51  ;;  %v5188_v14 = vmul.f32 %v803_v15, %v747_v8  ;;  %v941_v63 = vrot.slane %v5182_v51, 1  ;;  %v5196_v60 = vmul.f32 %v6368_v7, %v5182_v51  ;;  %v818_v6 = vrot.slane %v5182_v51, 7 }
 0x167   : > { %6366 = vst [vmem:[#allocation51_spill] sm:$0xff] %v5185_v55  ;;  %v5199_v1 = vmul.f32 %v801_v58, %v745_v49  ;;  %v5204_v9 = vmul.f32 %v6370_v12, %v5185_v55  ;;  %v816_v5 = vrot.slane %v5185_v55, 7  ;;  %v939_v8 = vrot.slane %v5185_v55, 1  ;;  %v5221_v12 = vpop.permute.xlu0 %1148 }
 0x168   : > { %v5212_v21 = vmul.f32 %v6372_v57, %v5185_v55  ;;  %v6373_v49 = vunpack.i.l.bf16 %v5032_v22  ;;  %6374 = vst [vmem:[#allocation55_spill] sm:$0xff] %v5221_v12  ;;  %v6376_v57 = vunpack.i.l.bf16 %v5074_v44  ;;  %v6379_v42 = vrot.slane %v5188_v14, 7 }
 0x169   : > { %6369 = vst [vmem:[#allocation53_spill] sm:$0xff] %v5199_v1  ;;  %6371 = vst [vmem:[#allocation54_spill] sm:$0xff] %v5204_v9  ;;  %v4437_v58 = vpop.eup %4436  ;;  %v940_v7 = vrot.slane %v5199_v1, 1  ;;  %v817_v9 = vrot.slane %v5199_v1, 7  ;;  %v5227_v25 = vmul.f32 %v6375_v50, %v5199_v1  ;;  %v6380_v50 = vunpack.i.h.bf16 %v5074_v44 }
 0x16a   : > { %v5218_v15 = vmul.f32 %v6373_v49, %v5188_v14  ;;  %v5232_v53 = vmul.f32 %v6376_v57, %v5199_v1  ;;  %v4439_v13 = vpop.eup %4438  ;;  %v6378_v49 = vrot.slane %v5188_v14, 1  ;;  %v806_v55 = vadd.f32 1.0, %v4437_v58 }
 0x16b   : > { %v5244_v59 = vsel %vm826_vm1, %v818_v6, %v6379_v42  ;;  %v5249_v33 = vmul.f32 %v6380_v50, %v5182_v51  ;;  %v5253_v57 = vsel %vm947_vm0, %v940_v7, %v941_v63  ;;  %v804_v58 = vadd.f32 1.0, %v4439_v13  ;;  %v5267_v50 = vpop.permute.xlu1 %1257 }
 0x16c   : > { %6377 = vst [vmem:[#allocation56_spill] sm:$0xff] %v5232_v53  ;;  %v5238_v35 = vsel %vm947_vm0, %v941_v63, %v6378_v49  ;;  %v954_v1 = vsel %vm947_vm0, %v939_v8, %v940_v7  ;;  %v5263_v42 = vmul.f32 %v5099_v61, %v5253_v57  ;;  %v5265_v53 = vmul.f32 %v806_v55, %v750_v52 }
 0x16d   : > { %6381 = vst [vmem:[#allocation57_spill] sm:$0xff] %v5249_v33  ;;  %v5257_v49 = vmul.f32 %v5160_v18, %v5238_v35  ;;  %6383 = vst [vmem:[#allocation59_spill] sm:$0xff] %v5267_v50  ;;  %v5270_v44 = vmul.f32 %v5038_v29, %v954_v1  ;;  %v6384_v63 = vunpack.i.l.bf16 %v5056_v37  ;;  %v4441_v18 = vpop.eup %4440  ;;  %v5276_v13 = vmul.f32 %v804_v58, %v748_v62  ;;  %v5289_v58 = vpop.permute.xlu0 %1242 }
 0x16e   : > { %6382 = vst [vmem:[#allocation58_spill] sm:$0xff] %v5263_v42  ;;  %v5279_v7 = vmul.f32 %v5267_v50, %v954_v1  ;;  %v833_v61 = vsel %vm826_vm1, %v816_v5, %v817_v9  ;;  %v4443_v55 = vpop.eup %4442  ;;  %v807_v33 = vadd.f32 1.0, %v4441_v18  ;;  %6387 = vst [vmem:[#allocation62_spill] sm:$0xff] %v5289_v58  ;;  %v832_v52 = vsel %vm826_vm1, %v817_v9, %v818_v6 }
 0x16f   : > { %v5274_v51 = vmul.f32 %v6384_v63, %v954_v1  ;;  %v805_v62 = vadd.f32 1.0, %v4443_v55  ;;  %v6388_v1 = vunpack.i.h.bf16 %v5026_v11  ;;  %v5294_v37 = vmul.f32 %v5068_v41, %v833_v61 }
 0x170   : > { %6386 = vst [vmem:[#allocation61_spill] sm:$0xff] %v5279_v7  ;;  %v5298_v38 = vmul.f32 %v807_v33, %v751_v16  ;;  %v6389_v18 = vunpack.i.l.bf16 %v5046_v32  ;;  %v6390_v55 = vunpack.i.h.bf16 %v5046_v32  ;;  %v5310_v42 = vmul.f32 %v5078_v46, %v832_v52 }
 0x171   : > { %6385 = vst [vmem:[#allocation60_spill] sm:$0xff] %v5274_v51  ;;  %v945_v51 = vrot.slane %v5265_v53, 1  ;;  %v1049_v50 = vmul.f32 %v6388_v1, %v833_v61  ;;  %v5312_v1 = vmul.f32 %v805_v62, %v749_v2  ;;  %v5315_v41 = vmul.f32 %v5034_v26, %v833_v61 }
 0x172   : > { %v5302_v29 = vmul.f32 %v6389_v18, %v832_v52  ;;  %v5307_v63 = vmul.f32 %v6390_v55, %v5244_v59  ;;  %v5318_v33 = vmul.f32 %v5024_v10, %v832_v52  ;;  %v6391_v16 = vunpack.i.h.bf16 %v5032_v22 }
 0x173   : > { %v823_v9 = vrot.slane %v5298_v38, 7  ;;  %v946_v18 = vrot.slane %v5298_v38, 1  ;;  %v6392_v55 = vunpack.i.l.bf16 %v5022_v4  ;;  %v944_v62 = vrot.slane %v5312_v1, 1  ;;  %v4309_v4 = vld [vmem:[#allocation2 + $0x100] sm:$0xff]  }
 0x174   : > { %v5323_v6 = vmul.f32 %v6391_v16, %v5276_v13  ;;  %v1057_v61 = vpack.c.bf16 %v5307_v63, %v5302_v29  ;;  %v5339_v10 = vmul.f32 %v5040_v30, %v5253_v57 }
 0x175   : > { %v927_v2 = vmul.f32 %v6392_v55, %v5298_v38  ;;  %v834_v26 = vsel %vm826_vm1, %v823_v9, %v816_v5  ;;  %v6393_v55 = vrot.slane %v5265_v53, 7  ;;  %v5351_v63 = vsel %vm947_vm0, %v945_v51, %v946_v18 }
 0x176   : > { %v955_v16 = vsel %vm947_vm0, %v946_v18, %v939_v8  ;;  %v5356_v52 = vmul.f32 %v5171_v54, %v834_v26  ;;  %v5364_v5 = vmul.f32 %v5191_v56, %v5351_v63  ;;  %v6396_v54 = vunpack.i.h.bf16 %v5080_v47 }
 0x177   : > { %v5347_v29 = vsel %vm826_vm1, %v6393_v55, %v823_v9  ;;  %v5368_v9 = vsel %vm947_vm0, %v944_v62, %v945_v51  ;;  %v5370_v55 = vpop.permute.xlu0 %1252  ;;  %v996_v18 = vmul.f32 %v5028_v17, %v955_v16  ;;  %v935_v51 = vpack.c.bf16 %v5212_v21, %v927_v2 }
 0x178   : > { %v5360_v30 = vmul.f32 %v5221_v12, %v5347_v29  ;;  %6394 = vst [vmem:[#allocation63_spill] sm:$0xff] %v5370_v55  ;;  %v5374_v8 = vmul.f32 %v5289_v58, %v5368_v9  ;;  %v5379_v12 = vmul.f32 %v6396_v54, %v955_v16  ;;  %v5382_v46 = vmul.f32 %v5370_v55, %v955_v16 }
 0x179   : > { %v875_v32 = vmul.f32 %v5030_v19, %v5347_v29  ;;  %v876_v58 = vmul.f32 %v5020_v0, %v834_v26  ;;  %v1004_v22 = vpack.c.bf16 %v5270_v44, %v996_v18  ;;  %v6398_v16 = vunpack.i.l.bf16 %v5026_v11  ;;  %1887 = vmatprep.mubr.bf16.mxu1 %v935_v51  ;;  %v4311_v19 = vld [vmem:[#allocation2 + $0x180] sm:$0xff]   ;;  %v4312_v51 = vld [vmem:[#allocation2 + $0x148] sm:$0xff]  }
 0x17a   : > { %6395 = vst [vmem:[#allocation64_spill] sm:$0xff] %v5374_v8  ;;  %6397 = vst [vmem:[#allocation65_spill] sm:$0xff] %v5382_v46  ;;  %v5399_v21 = vmul.f32 %v5050_v23, %v5238_v35  ;;  %v820_v2 = vrot.slane %v5276_v13, 7  ;;  %v821_v0 = vrot.slane %v5312_v1, 7  ;;  %v5405_v44 = vmul.f32 %v5042_v31, %v5244_v59 }
 0x17b   : > { %v1048_v55 = vmul.f32 %v6398_v16, %v834_v26  ;;  %v883_v56 = vpack.c.bf16 %v876_v58, %v875_v32  ;;  %v6399_v26 = vunpack.i.l.bf16 %v5044_v24  ;;  %v6400_v32 = vunpack.i.h.bf16 %v5044_v24  ;;  %v4314_v16 = vld [vmem:[#allocation2 + $0x1c8] sm:$0xff]  }
 0x17c   : > { %v6401_v54 = vrot.slane %v5188_v14, 7  ;;  %v943_v24 = vrot.slane %v5276_v13, 1  ;;  %v6403_v23 = vunpack.i.h.bf16 %v5058_v28 }
 0x17d   : > { %v1056_v17 = vpack.c.bf16 %v1049_v50, %v1048_v55  ;;  %v5410_v18 = vmul.f32 %v6399_v26, %v5312_v1  ;;  %v5415_v58 = vmul.f32 %v6400_v32, %v5265_v53  ;;  %1888 = vmatmul.mubr.bf16.vlgmr.msra.gmra.mrb[0].mxu1 %v883_v56  ;;  %v5421_v55 = vsel %vm826_vm1, %v820_v2, %v821_v0  ;;  %v4313_v56 = vld [vmem:[#allocation2 + $0x108] sm:$0xff]  }
 0x17e   : > { %v5427_v26 = vsel %vm826_vm1, %v6401_v54, %v820_v2  ;;  %3766 = vmatpush3.bf16.msra.mxu1 %v4309_v4  ;;  %v6402_v50 = vunpack.i.l.bf16 %v5058_v28  ;;  %v5439_v11 = vmul.f32 %v6403_v23, %v5421_v55  ;;  %v6404_v4 = vpack.c.bf16 %v5196_v60, %v5227_v25  ;;  %v4315_v2 = vld [vmem:[#allocation2 + $0x188] sm:$0xff]  }
 0x17f   : > { %1952 = vmatprep.mubr.bf16.mxu0 %v1056_v17  ;;  %v5443_v54 = vmul.f32 %v5036_v27, %v5427_v26  ;;  %v4316_v17 = vld [vmem:[#allocation2 + $0x150] sm:$0xff]   ;;  %v950_v32 = vsel %vm947_vm0, %v943_v24, %v944_v62  ;;  %v6405_v23 = vrot.slane %v5188_v14, 1  ;;  %3767 = vmatprep.subr.bf16.mxu1 %v4312_v51  ;;  %v6407_v51 = vunpack.i.h.bf16 %v5066_v40  ;;  %v6408_v25 = vld [vmem:[#allocation30_spill] sm:$0xff]  ;;  %v6415_v62 = vld [vmem:[#allocation57_spill] sm:$0xff] }
 0x180   : > { %v5434_v31 = vmul.f32 %v6402_v50, %v5427_v26  ;;  %1895 = vmatprep.mubr.bf16.mxu1 %v6404_v4  ;;  %1953 = vmatmul.mubr.bf16.vlgmr.msra.gmra.mrb[8].mxu0 %v1004_v22  ;;  %v4318_v4 = vld [vmem:[#allocation2 + $0x1d0] sm:$0xff]   ;;  %v5486_v50 = vmul.f32 %v5054_v36, %v5421_v55  ;;  %v5490_v28 = vmul.f32 %v6408_v25, %v5368_v9  ;;  %v6412_v25 = vld [vmem:[#allocation28_spill] sm:$0xff] }
 0x181   : > { %v951_v27 = vsel %vm947_vm0, %v6405_v23, %v943_v24  ;;  %1960 = vmatprep.mubr.bf16.mxu0 %v1057_v61  ;;  %3806 = vmatpush3.bf16.msra.mxu0 %v4311_v19  ;;  %v5467_v24 = vmul.f32 %v5062_v39, %v950_v32  ;;  %v5473_v61 = vmul.f32 %v5180_v45, %v950_v32  ;;  %v6410_v45 = vld [vmem:[#allocation24_spill] sm:$0xff] }
 0x182   : > { %v1058_v22 = vpack.c.bf16 %v5439_v11, %v5434_v31  ;;  %v5463_v60 = vmul.f32 %v5052_v34, %v951_v27  ;;  %3807 = vmatprep.subr.bf16.mxu0 %v4314_v16  ;;  %v5470_v19 = vmul.f32 %v5127_v3, %v951_v27  ;;  %3768 = vmatpush3.bf16.msra.mxu1 %v4313_v56  ;;  %v4317_v11 = vld [vmem:[#allocation2 + $0x110] sm:$0xff]   ;;  %v6406_v31 = vrot.slane %v5265_v53, 7  ;;  %v4320_v56 = vld [vmem:[#allocation2 + $0x158] sm:$0xff]  }
 0x183   : > { %v5482_v16 = vmul.f32 %v6407_v51, %v5347_v29  ;;  %3769 = vmatprep.subr.bf16.mxu1 %v4316_v17  ;;  %v6411_v51 = vld [vmem:[#allocation35_spill] sm:$0xff]  ;;  %v6413_v17 = vunpack.i.h.bf16 %v6412_v25  ;;  %v6414_v34 = vld [vmem:[#allocation56_spill] sm:$0xff]  ;;  %v6421_v25 = vld [vmem:[#allocation42_spill] sm:$0xff] }
 0x184   : > { %v828_v23 = vsel %vm826_vm1, %v821_v0, %v6406_v31  ;;  %v6409_v0 = vunpack.i.l.bf16 %v5066_v40  ;;  %v5503_v36 = vmul.f32 %v6411_v51, %v5351_v63  ;;  %v4319_v3 = vld [vmem:[#allocation2 + $0x190] sm:$0xff]   ;;  %v6312_v46 = vunpack.i.l.bf16 %v6421_v25 }
 0x185   : > { %v5499_v29 = vmul.f32 %v6410_v45, %v828_v23  ;;  %3808 = vmatpush3.bf16.msra.mxu0 %v4315_v2  ;;  %v5508_v39 = vmul.f32 %v6413_v17, %v5253_v57  ;;  %v6416_v40 = vld [vmem:[#allocation51_spill] sm:$0xff]  ;;  %v6418_v45 = vld [vmem:[#allocation32_spill] sm:$0xff]  ;;  %v6420_v2 = vpack.c.bf16 %v5318_v33, %v5315_v41 }
 0x186   : > { %v5496_v31 = vmul.f32 %v6409_v0, %v828_v23  ;;  %v6417_v0 = vld [vmem:[#allocation53_spill] sm:$0xff]  ;;  %v6419_v7 = vunpack.i.l.bf16 %v6418_v45  ;;  %3809 = vmatprep.subr.bf16.mxu0 %v4318_v4  ;;  %v4322_v57 = vld [vmem:[#allocation2 + $0x1d8] sm:$0xff]   ;;  %3770 = vmatpush3.bf16.msra.mxu1 %v4317_v11  ;;  %v6425_v11 = vpack.c.bf16 %v5399_v21, %v5339_v10  ;;  %v6428_v4 = vld [vmem:[#allocation50_spill] sm:$0xff] }
 0x187   : > { %1896 = vmatmul.mubr.bf16.gmra.mrb[4].mxu1 %v6420_v2  ;;  %v4321_v41 = vld [vmem:[#allocation2 + $0x118] sm:$0xff]   ;;  %v6424_v2 = vunpack.i.h.bf16 %v6418_v45  ;;  %3771 = vmatprep.subr.bf16.mxu1 %v4320_v56  ;;  %v6430_v56 = vunpack.i.l.bf16 %v5072_v43 }
 0x188   : > { %v5517_v8 = vmul.f32 %v6419_v7, %v5238_v35  ;;  %v1059_v17 = vpack.c.bf16 %v5482_v16, %v5496_v31  ;;  %v6422_v7 = vpack.c.bf16 %v5323_v6, %v5218_v15  ;;  %v6423_v33 = vld [vmem:[#allocation60_spill] sm:$0xff]  ;;  %1961 = vmatmul.mubr.bf16.gmra.mrb[12].mxu0 %v6425_v11  ;;  %v4324_v15 = vld [vmem:[#allocation2 + $0x160] sm:$0xff]   ;;  %v6426_v6 = vunpack.i.l.bf16 %v5082_v48 }
 0x189   : > { %v5537_v16 = vmul.f32 %v6424_v2, %v951_v27  ;;  %v6427_v27 = vunpack.i.h.bf16 %v5082_v48  ;;  %1968 = vmatprep.mubr.bf16.mxu0 %v1058_v22  ;;  %3810 = vmatpush3.bf16.msra.mxu0 %v4319_v3  ;;  %v4323_v10 = vld [vmem:[#allocation2 + $0x198] sm:$0xff]   ;;  %v5562_v11 = vmul.f32 %v6430_v56, %v950_v32  ;;  %v4326_v35 = vld [vmem:[#allocation2 + $0x1e0] sm:$0xff]   ;;  %v5582_v32 = vmul.f32 %v6312_v46, %v5312_v1  ;;  %v4328_v46 = vld [vmem:[#allocation2 + $0x168] sm:$0xff]  }
 0x18a   : > { %1903 = vmatprep.mubr.bf16.mxu1 %v6422_v7  ;;  %v5548_v7 = vmul.f32 %v6426_v6, %v5188_v14  ;;  %v6431_v6 = vunpack.i.h.bf16 %v5072_v43  ;;  %3811 = vmatprep.subr.bf16.mxu0 %v4322_v57  ;;  %v6432_v3 = vld [vmem:[#allocation37_spill] sm:$0xff]  ;;  %v6433_v21 = vld [vmem:[#allocation40_spill] sm:$0xff]  ;;  %v6434_v56 = vunpack.i.h.bf16 %v6421_v25  ;;  %v6436_v57 = vld [vmem:[#allocation39_spill] sm:$0xff] }
 0x18b   : > { %v5553_v2 = vmul.f32 %v6427_v27, %v5276_v13  ;;  %v5573_v22 = vmul.f32 %v6432_v3, %v5244_v59  ;;  %v5577_v51 = vmul.f32 %v6433_v21, %v5427_v26  ;;  %3772 = vmatpush3.bf16.msra.mxu1 %v4321_v41  ;;  %v6435_v26 = vunpack.i.l.bf16 %v5080_v47  ;;  %v6437_v25 = vld [vmem:[#allocation45_spill] sm:$0xff] }
 0x18c   : > { %v5567_v27 = vmul.f32 %v6431_v6, %v5368_v9  ;;  %v4325_v9 = vld [vmem:[#allocation2 + $0x120] sm:$0xff]   ;;  %v5589_v6 = vmul.f32 %v6434_v56, %v5265_v53  ;;  %3773 = vmatprep.subr.bf16.mxu1 %v4324_v15  ;;  %v5602_v21 = vmul.f32 %v6436_v57, %v5421_v55  ;;  %v5605_v56 = vmul.f32 %v6437_v25, %v828_v23  ;;  %v4329_v55 = vld [vmem:[#allocation2 + $0x128] sm:$0xff]  }
 0x18d   : > { %v5596_v31 = vmul.f32 %v6435_v26, %v5351_v63  ;;  %v1165_v41 = vpack.c.bf16 %v5577_v51, %v5573_v22  ;;  %v6438_v59 = vunpack.i.l.bf16 %v6429_v20  ;;  %3812 = vmatpush3.bf16.msra.mxu0 %v4323_v10  ;;  %v4327_v63 = vld [vmem:[#allocation2 + $0x1a0] sm:$0xff]   ;;  %v6439_v22 = vpack.c.bf16 %v5443_v54, %v5405_v44  ;;  %v4332_v44 = vld [vmem:[#allocation2 + $0x170] sm:$0xff]   ;;  %v4331_v54 = vld [vmem:[#allocation2 + $0x1a8] sm:$0xff]  }
 0x18e   : > { %v1218_v15 = vpack.c.bf16 %v5589_v6, %v5582_v32  ;;  %3813 = vmatprep.subr.bf16.mxu0 %v4326_v35  ;;  %v1166_v10 = vpack.c.bf16 %v5605_v56, %v5602_v21  ;;  %v6440_v32 = vld [vmem:[#allocation54_spill] sm:$0xff]  ;;  %v6441_v26 = vpack.c.bf16 %v5415_v58, %v5410_v18  ;;  %v6442_v23 = vpack.c.bf16 %v5467_v24, %v5463_v60  ;;  %v4334_v35 = vld [vmem:[#allocation2 + $0x1f0] sm:$0xff]   ;;  %v4338_v58 = vld [vmem:[#allocation2 + $0x1f8] sm:$0xff]  }
 0x18f   : > { %v5610_v3 = vmul.f32 %v6438_v59, %v5298_v38  ;;  %v1115_v51 = vpack.c.bf16 %v5379_v12, %v5596_v31  ;;  %1904 = vmatmul.mubr.bf16.gmra.mrb[8].mxu1 %v6439_v22  ;;  %v4330_v59 = vld [vmem:[#allocation2 + $0x1e8] sm:$0xff]   ;;  %v4333_v21 = vld [vmem:[#allocation2 + $0x130] sm:$0xff]   ;;  %v6443_v18 = vpack.c.bf16 %v5499_v29, %v5486_v50  ;;  %v4337_v60 = vld [vmem:[#allocation2 + $0x138] sm:$0xff]   ;;  %v6445_v24 = vpack.c.bf16 %v5503_v36, %v5490_v28 }
 0x190   : > { %3774 = vmatpush3.bf16.msra.mxu1 %v4325_v9  ;;  %1911 = vmatprep.mubr.bf16.mxu1 %v6441_v26  ;;  %v4335_v9 = vld [vmem:[#allocation2 + $0x1b0] sm:$0xff]   ;;  %v6446_v56 = vpack.c.bf16 %v6415_v62, %v6414_v34  ;;  %v4339_v50 = vld [vmem:[#allocation2 + $0x1b8] sm:$0xff]   ;;  %v4341_v29 = vld [vmem:[#allocation2 + $0x208] sm:$0xff]   ;;  %v6448_v36 = vpack.c.bf16 %v5537_v16, %v5517_v8  ;;  %v6449_v28 = vpack.c.bf16 %v5310_v42, %v5294_v37 }
 0x191   : > { %v1219_v6 = vpack.c.bf16 %v6440_v32, %v5610_v3  ;;  %1969 = vmatmul.mubr.bf16.gmra.mrb[16].mxu0 %v6442_v23  ;;  %3775 = vmatprep.subr.bf16.mxu1 %v4328_v46  ;;  %v4336_v3 = vld [vmem:[#allocation2 + $0x178] sm:$0xff]   ;;  %v6444_v46 = vpack.c.bf16 %v5508_v39, %v6423_v33  ;;  %v6447_v39 = vpack.c.bf16 %v6417_v0, %v6416_v40  ;;  %v4342_v34 = vld [vmem:[#allocation2 + $0x210] sm:$0xff]   ;;  %v4344_v37 = vld [vmem:[#allocation2 + $0x220] sm:$0xff]  }
 0x192   : > { %1976 = vmatprep.mubr.bf16.mxu0 %v1059_v17  ;;  %3814 = vmatpush3.bf16.msra.mxu0 %v4327_v63  ;;  %v4340_v17 = vld [vmem:[#allocation2 + $0x200] sm:$0xff]   ;;  %v6450_v62 = vpack.c.bf16 %v5553_v2, %v5548_v7  ;;  %v4343_v33 = vld [vmem:[#allocation2 + $0x218] sm:$0xff]   ;;  %v6451_v40 = vpack.c.bf16 %v5188_v14, %v6428_v4  ;;  %v6452_v8 = vpack.c.bf16 %v5567_v27, %v5562_v11  ;;  %v4345_v42 = vld [vmem:[#allocation2 + $0x228] sm:$0xff]  }
 0x193   : > { %3815 = vmatprep.subr.bf16.mxu0 %v4330_v59  ;;  %v6453_v0 = vpack.c.bf16 %v5312_v1, %v5276_v13  ;;  %v4346_v14 = vld [vmem:[#allocation2 + $0x230] sm:$0xff]   ;;  %v4347_v4 = vld [vmem:[#allocation2 + $0x238] sm:$0xff]   ;;  %v6454_v16 = vpack.c.bf16 %v5298_v38, %v5265_v53  ;;  %v6455_v13 = vld [vmem:[#allocation58_spill] sm:$0xff]  ;;  %v6457_v12 = vpack.c.bf16 %v5356_v52, %v5360_v30  ;;  %v6458_v31 = vpack.c.bf16 %v5473_v61, %v5470_v19 }
 0x194   : > { %3776 = vmatpush3.bf16.msra.mxu1 %v4329_v55  ;;  %v6456_v1 = vpack.c.bf16 %v5257_v49, %v6455_v13  ;;  %v6459_v7 = vld [vmem:[#allocation64_spill] sm:$0xff]  ;;  %v6461_v38 = vld [vmem:[#allocation61_spill] sm:$0xff]  ;;  %v4352_v30 = vld [vmem:[#allocation4 + $0x48] sm:$0xff]  }
 0x195   : > { %3777 = vmatprep.subr.bf16.mxu1 %v4332_v44  ;;  %v6460_v2 = vpack.c.bf16 %v5364_v5, %v6459_v7  ;;  %v6462_v53 = vld [vmem:[#allocation65_spill] sm:$0xff]  ;;  %v4353_v52 = vld [vmem:[#allocation4 + $0x8] sm:$0xff]   ;;  %v4356_v5 = vld [vmem:[#allocation4 + $0x50] sm:$0xff]  }
 0x196   : > { %3816 = vmatpush3.bf16.msra.mxu0 %v4331_v54  ;;  %v6463_v11 = vpack.c.bf16 %v6461_v38, %v6462_v53  ;;  %v4348_v49 = vld [vmem:[#allocation4 + $0x40] sm:$0xff]   ;;  %v4354_v19 = vld [vmem:[#allocation4 + $0xc8] sm:$0xff]   ;;  %v4359_v55 = vld [vmem:[#allocation4 + $0x90] sm:$0xff]  }
 0x197   : > { %1912 = vmatmul.mubr.bf16.gmra.mrb[12].mxu1 %v6443_v18  ;;  %3817 = vmatprep.subr.bf16.mxu0 %v4334_v35  ;;  %v4349_v27 = vld [vmem:[#allocation4] sm:$0xff]   ;;  %v4355_v61 = vld [vmem:[#allocation4 + $0x88] sm:$0xff]   ;;  %v4360_v23 = vld [vmem:[#allocation4 + $0x58] sm:$0xff]  }
 0x198   : > { %3778 = vmatpush3.bf16.msra.mxu1 %v4333_v21  ;;  %2017 = vmatprep.mubr.bf16.mxu1 %v6444_v46  ;;  %v4351_v63 = vld [vmem:[#allocation4 + $0x80] sm:$0xff]   ;;  %v4361_v22 = vld [vmem:[#allocation4 + $0x18] sm:$0xff]   ;;  %v4368_v54 = vld [vmem:[#allocation4 + $0x68] sm:$0xff]  }
 0x199   : > { %1977 = vmatmul.mubr.bf16.gmra.mrb[20].mxu0 %v6445_v24  ;;  %3779 = vmatprep.subr.bf16.mxu1 %v4336_v3  ;;  %v4362_v59 = vld [vmem:[#allocation4 + $0xd8] sm:$0xff]   ;;  %v4364_v32 = vld [vmem:[#allocation4 + $0x60] sm:$0xff]   ;;  %v4369_v35 = vld [vmem:[#allocation4 + $0x28] sm:$0xff]  }
 0x19a   : > { %3818 = vmatpush3.bf16.msra.mxu0 %v4335_v9  ;;  %2082 = vmatprep.mubr.bf16.mxu0 %v6446_v56  ;;  %v4366_v26 = vld [vmem:[#allocation4 + $0xe0] sm:$0xff]   ;;  %v4370_v21 = vld [vmem:[#allocation4 + $0xe8] sm:$0xff]   ;;  %v4372_v9 = vld [vmem:[#allocation4 + $0x70] sm:$0xff]  }
 0x19b   : > { %3819 = vmatprep.subr.bf16.mxu0 %v4338_v58  ;;  %v4367_v44 = vld [vmem:[#allocation4 + $0xa0] sm:$0xff]   ;;  %v4371_v3 = vld [vmem:[#allocation4 + $0xa8] sm:$0xff]   ;;  %v4373_v18 = vld [vmem:[#allocation4 + $0x30] sm:$0xff]  }
 0x19c   : > { %3780 = vmatpush3.bf16.msra.mxu1 %v4337_v60  ;;  %v4374_v58 = vld [vmem:[#allocation4 + $0xf0] sm:$0xff]   ;;  %v4376_v46 = vld [vmem:[#allocation4 + $0x78] sm:$0xff]   ;;  %v4380_v56 = vld [vmem:[#allocation4 + $0x140] sm:$0xff]  }
 0x19d   : > { %4065 = vmatprep.subr.bf16.mxu1 %v4340_v17  ;;  %v4375_v60 = vld [vmem:[#allocation4 + $0xb0] sm:$0xff]   ;;  %v4377_v24 = vld [vmem:[#allocation4 + $0x38] sm:$0xff]  }
 0x19e   : > { %3820 = vmatpush3.bf16.msra.mxu0 %v4339_v50  ;;  %v4379_v50 = vld [vmem:[#allocation4 + $0xb8] sm:$0xff]  }
 0x19f   : > { %2018 = vmatmul.mubr.bf16.vlgmr.msra.gmra.mrb[16].mxu1 %v6447_v39  ;;  %3857 = vmatprep.subr.bf16.mxu0 %v4348_v49 }
 0x1a0   : > { %4066 = vmatpush3.bf16.msra.mxu1 %v4340_v17  ;;  %2025 = vmatprep.mubr.bf16.mxu1 %v6448_v36  ;;  %v4378_v17 = vld [vmem:[#allocation4 + $0xf8] sm:$0xff]   ;;  %v3514_v36 = vld [vmem:[%s6232_s4] ss:$0 sm:$0xff] }
 0x1a1   : > { %2083 = vmatmul.mubr.bf16.vlgmr.msra.gmra.mrb[24].mxu0 %v6449_v28  ;;  %4067 = vmatprep.subr.bf16.mxu1 %v4341_v29 }
 0x1a2   : > { %2090 = vmatprep.mubr.bf16.mxu0 %v6450_v62  ;;  %3858 = vmatpush3.bf16.msra.mxu0 %v4349_v27 }
 0x1a3   : > { %3859 = vmatprep.subr.bf16.mxu0 %v4352_v30 }
 0x1a4   : > { %4068 = vmatpush3.bf16.msra.mxu1 %v4341_v29  ;;  %v4382_v29 = vld [vmem:[#allocation4 + $0x1c0] sm:$0xff]  }
 0x1a5   : > { %4069 = vmatprep.subr.bf16.mxu1 %v4342_v34 }
 0x1a6   : > { %3860 = vmatpush3.bf16.msra.mxu0 %v4353_v52 }
 0x1a7   : > { %2026 = vmatmul.mubr.bf16.gmra.mrb[20].mxu1 %v6451_v40  ;;  %3861 = vmatprep.subr.bf16.mxu0 %v4356_v5 }
 0x1a8   : > { %4070 = vmatpush3.bf16.msra.mxu1 %v4342_v34  ;;  %2033 = vmatprep.mubr.bf16.mxu1 %v6452_v8 }
 0x1a9   : > { %2091 = vmatmul.mubr.bf16.gmra.mrb[28].mxu0 %v1165_v41  ;;  %4071 = vmatprep.subr.bf16.mxu1 %v4343_v33  ;;  %v4350_v41 = vld [vmem:[#allocation4 + $0xc0] sm:$0xff]  }
 0x1aa   : > { %2098 = vmatprep.mubr.bf16.mxu0 %v1218_v15  ;;  %v4357_v15 = vld [vmem:[#allocation4 + $0x10] sm:$0xff]  }
 0x1ab   : > { %3862 = vmatpush3.bf16.msra.mxu0 %v4357_v15 }
 0x1ac   : > { %4072 = vmatpush3.bf16.msra.mxu1 %v4343_v33  ;;  %3863 = vmatprep.subr.bf16.mxu0 %v4360_v23 }
 0x1ad   : > { %4073 = vmatprep.subr.bf16.mxu1 %v4344_v37 }
 0x1af   : > { %2034 = vmatmul.mubr.bf16.gmra.mrb[24].mxu1 %v6453_v0  ;;  %3864 = vmatpush3.bf16.msra.mxu0 %v4361_v22 }
 0x1b0   : > { %4074 = vmatpush3.bf16.msra.mxu1 %v4344_v37  ;;  %2041 = vmatprep.mubr.bf16.mxu1 %v1115_v51  ;;  %v4358_v51 = vld [vmem:[#allocation4 + $0xd0] sm:$0xff]  }
 0x1b1   : > { %2099 = vmatmul.mubr.bf16.gmra.mrb[32].mxu0 %v1166_v10  ;;  %4075 = vmatprep.subr.bf16.mxu1 %v4345_v42  ;;  %v4363_v10 = vld [vmem:[#allocation4 + $0x98] sm:$0xff]  }
 0x1b2   : > { %2106 = vmatprep.mubr.bf16.mxu0 %v1219_v6  ;;  %v4365_v6 = vld [vmem:[#allocation4 + $0x20] sm:$0xff]   ;;  %3865 = vmatprep.subr.bf16.mxu0 %v4364_v32 }
 0x1b3   : > { %3866 = vmatpush3.bf16.msra.mxu0 %v4365_v6 }
 0x1b4   : > { %4076 = vmatpush3.bf16.msra.mxu1 %v4345_v42  ;;  %3867 = vmatprep.subr.bf16.mxu0 %v4368_v54 }
 0x1b5   : > { %4077 = vmatprep.subr.bf16.mxu1 %v4346_v14 }
 0x1b7   : > { %2042 = vmatmul.mubr.bf16.gmra.mrb[28].mxu1 %v6454_v16  ;;  %3868 = vmatpush3.bf16.msra.mxu0 %v4369_v35 }
 0x1b8   : > { %4078 = vmatpush3.bf16.msra.mxu1 %v4346_v14  ;;  %4081 = vmatprep.mubr.bf16.mxu1 %v6456_v1 }
 0x1b9   : > { %2107 = vmatmul.mubr.bf16.gmra.mrb[36].mxu0 %v6457_v12  ;;  %4079 = vmatprep.subr.bf16.mxu1 %v4347_v4 }
 0x1ba   : > { %3869 = vmatprep.subr.bf16.mxu0 %v4372_v9 }
 0x1bb   : > { %3870 = vmatpush3.bf16.msra.mxu0 %v4373_v18 }
 0x1bc   : > { %4080 = vmatpush3.bf16.msra.mxu1 %v4347_v4  ;;  %3871 = vmatprep.subr.bf16.mxu0 %v4376_v46 }
 0x1bd   : > { %3897 = vmatprep.subr.bf16.mxu1 %v4350_v41 }
 0x1bf   : > { %4082 = vmatmul.mubr.bf16.vlgmr.msra.gmra.mrb[32].mxu1 %v6458_v31  ;;  %3872 = vmatpush3.bf16.msra.mxu0 %v4377_v24 }
 0x1c0   : > { %4085 = vmatprep.mubr.bf16.mxu1 %v6460_v2  ;;  %3898 = vmatpush3.bf16.msra.mxu1 %v4351_v63 }
 0x1c1   : > { %3899 = vmatprep.subr.bf16.mxu1 %v4354_v19  ;;  %3937 = vmatprep.subr.bf16.mxu0 %v4380_v56 }
 0x1c4   : > { %3900 = vmatpush3.bf16.msra.mxu1 %v4355_v61 }
 0x1c5   : > { %3901 = vmatprep.subr.bf16.mxu1 %v4358_v51 }
 0x1c7   : > { %4086 = vmatmul.mubr.bf16.gmra.mrb[36].mxu1 %v6463_v11 }
 0x1c8   : > { %3902 = vmatpush3.bf16.msra.mxu1 %v4359_v55 }
 0x1c9   : > { %3903 = vmatprep.subr.bf16.mxu1 %v4362_v59 }
 0x1cc   : > { %3904 = vmatpush3.bf16.msra.mxu1 %v4363_v10 }
 0x1cd   : > { %3905 = vmatprep.subr.bf16.mxu1 %v4366_v26 }
 0x1d0   : > { %3906 = vmatpush3.bf16.msra.mxu1 %v4367_v44 }
 0x1d1   : > { %3907 = vmatprep.subr.bf16.mxu1 %v4370_v21 }
 0x1d4   : > { %3908 = vmatpush3.bf16.msra.mxu1 %v4371_v3 }
 0x1d5   : > { %3909 = vmatprep.subr.bf16.mxu1 %v4374_v58 }
 0x1d8   : > { %3910 = vmatpush3.bf16.msra.mxu1 %v4375_v60 }
 0x1d9   : > { %3911 = vmatprep.subr.bf16.mxu1 %v4378_v17 }
 0x1dc   : > { %3912 = vmatpush3.bf16.msra.mxu1 %v4379_v50 }
 0x1dd   : > { %3977 = vmatprep.subr.bf16.mxu1 %v4382_v29 }
 0x250   : > { %v3701_v39 = vpop.f32.mrb[0].mxu1 }
 0x251   : > { %v3702_v28 = vpop.f32.mrb[1].mxu1 }
 0x252   : > { %v3703_v34 = vadd.f32 %v3702_v28, %v3701_v39  ;;  %v3704_v33 = vpop.f32.mrb[2].mxu1 }
 0x253   : > { %v3741_v62 = vpop.f32.mrb[8].mxu0  ;;  %v3705_v8 = vpop.f32.mrb[3].mxu1 }
 0x254   : > { %v3742_v40 = vpop.f32.mrb[9].mxu0  ;;  %v1890_v37 = vadd.f32 %v3703_v34, %v3514_v36  ;;  %v3706_v0 = vadd.f32 %v3705_v8, %v3704_v33 }
 0x255   : > { %v3743_v42 = vadd.f32 %v3742_v40, %v3741_v62  ;;  %v3744_v14 = vpop.f32.mrb[10].mxu0 }
 0x256   : > { %v3745_v4 = vpop.f32.mrb[11].mxu0  ;;  %v1893_v13 = vadd.f32 %v3706_v0, %v3514_v36 }
 0x257   : > { %v1955_v16 = vadd.f32 %v3743_v42, %v1890_v37  ;;  %v3746_v1 = vadd.f32 %v3745_v4, %v3744_v14 }
 0x259   : > { %v1958_v12 = vadd.f32 %v3746_v1, %v1893_v13 }
 0x25a   : > { %v3707_v31 = vpop.f32.mrb[4].mxu1 }
 0x25b   : > { %v3708_v7 = vpop.f32.mrb[5].mxu1  ;;  %v3747_v38 = vpop.f32.mrb[12].mxu0 }
 0x25c   : > { %v3709_v2 = vadd.f32 %v3708_v7, %v3707_v31  ;;  %v3710_v53 = vpop.f32.mrb[6].mxu1  ;;  %v3748_v11 = vpop.f32.mrb[13].mxu0 }
 0x25d   : > { %v3711_v49 = vpop.f32.mrb[7].mxu1  ;;  %v3749_v41 = vadd.f32 %v3748_v11, %v3747_v38  ;;  %v3750_v30 = vpop.f32.mrb[14].mxu0 }
 0x25e   : > { %v1898_v27 = vadd.f32 %v3709_v2, %v3514_v36  ;;  %v3712_v63 = vadd.f32 %v3711_v49, %v3710_v53  ;;  %v3751_v52 = vpop.f32.mrb[15].mxu0 }
 0x25f   : > { %v3752_v5 = vadd.f32 %v3751_v52, %v3750_v30 }
 0x260   : > { %v1963_v19 = vadd.f32 %v3749_v41, %v1898_v27  ;;  %v1901_v61 = vadd.f32 %v3712_v63, %v3514_v36 }
 0x262   : > { %v1966_v15 = vadd.f32 %v3752_v5, %v1901_v61  ;;  %v3713_v51 = vpop.f32.mrb[8].mxu1 }
 0x263   : > { %v3714_v55 = vpop.f32.mrb[9].mxu1 }
 0x264   : > { %v3715_v23 = vadd.f32 %v3714_v55, %v3713_v51  ;;  %v3753_v22 = vpop.f32.mrb[16].mxu0  ;;  %v3716_v59 = vpop.f32.mrb[10].mxu1 }
 0x265   : > { %v3754_v10 = vpop.f32.mrb[17].mxu0  ;;  %v3717_v32 = vpop.f32.mrb[11].mxu1 }
 0x266   : > { %v1906_v6 = vadd.f32 %v3715_v23, %v3514_v36  ;;  %v3755_v26 = vadd.f32 %v3754_v10, %v3753_v22  ;;  %v3718_v44 = vadd.f32 %v3717_v32, %v3716_v59  ;;  %v3756_v54 = vpop.f32.mrb[18].mxu0 }
 0x267   : > { %v3757_v35 = vpop.f32.mrb[19].mxu0 }
 0x268   : > { %v1971_v21 = vadd.f32 %v3755_v26, %v1906_v6  ;;  %v1909_v3 = vadd.f32 %v3718_v44, %v3514_v36  ;;  %v3758_v9 = vadd.f32 %v3757_v35, %v3756_v54 }
 0x26a   : > { %v1974_v18 = vadd.f32 %v3758_v9, %v1909_v3  ;;  %v3719_v58 = vpop.f32.mrb[12].mxu1 }
 0x26b   : > { %v3720_v46 = vpop.f32.mrb[13].mxu1 }
 0x26c   : > { %v3721_v60 = vadd.f32 %v3720_v46, %v3719_v58  ;;  %v3759_v24 = vpop.f32.mrb[20].mxu0  ;;  %v3722_v17 = vpop.f32.mrb[14].mxu1 }
 0x26d   : > { %v3760_v56 = vpop.f32.mrb[21].mxu0  ;;  %v3723_v50 = vpop.f32.mrb[15].mxu1 }
 0x26e   : > { %v1914_v29 = vadd.f32 %v3721_v60, %v3514_v36  ;;  %v3761_v39 = vadd.f32 %v3760_v56, %v3759_v24  ;;  %v3724_v28 = vadd.f32 %v3723_v50, %v3722_v17  ;;  %v3762_v34 = vpop.f32.mrb[22].mxu0 }
 0x26f   : > { %v3763_v62 = vpop.f32.mrb[23].mxu0 }
 0x270   : > { %v1979_v33 = vadd.f32 %v3761_v39, %v1914_v29  ;;  %v1917_v40 = vadd.f32 %v3724_v28, %v3514_v36  ;;  %v3764_v8 = vadd.f32 %v3763_v62, %v3762_v34 }
 0x272   : > { %v1982_v37 = vadd.f32 %v3764_v8, %v1917_v40  ;;  %v3781_v42 = vpop.f32.mrb[16].mxu1 }
 0x273   : > { %v3782_v0 = vpop.f32.mrb[17].mxu1 }
 0x274   : > { %v3783_v14 = vadd.f32 %v3782_v0, %v3781_v42  ;;  %v3821_v4 = vpop.f32.mrb[24].mxu0  ;;  %v3784_v13 = vpop.f32.mrb[18].mxu1 }
 0x275   : > { %v3822_v1 = vpop.f32.mrb[25].mxu0  ;;  %v3785_v31 = vpop.f32.mrb[19].mxu1 }
 0x276   : > { %v2020_v7 = vadd.f32 %v3783_v14, %v1955_v16  ;;  %v3823_v2 = vadd.f32 %v3822_v1, %v3821_v4  ;;  %v3786_v38 = vadd.f32 %v3785_v31, %v3784_v13  ;;  %v3824_v53 = vpop.f32.mrb[26].mxu0 }
 0x277   : > { %v3825_v11 = vpop.f32.mrb[27].mxu0 }
 0x278   : > { %v2023_v49 = vadd.f32 %v3786_v38, %v1958_v12  ;;  %v3826_v27 = vadd.f32 %v3825_v11, %v3824_v53  ;;  %v2085_v41 = vadd.f32 %v3823_v2, %v2020_v7 }
 0x27a   : > { %v3787_v63 = vpop.f32.mrb[20].mxu1  ;;  %v2088_v30 = vadd.f32 %v3826_v27, %v2023_v49 }
 0x27b   : > { %v3788_v36 = vpop.f32.mrb[21].mxu1 }
 0x27c   : > { %v3789_v52 = vadd.f32 %v3788_v36, %v3787_v63  ;;  %v3827_v61 = vpop.f32.mrb[28].mxu0  ;;  %v3790_v5 = vpop.f32.mrb[22].mxu1 }
 0x27d   : > { %v3828_v51 = vpop.f32.mrb[29].mxu0  ;;  %v3791_v55 = vpop.f32.mrb[23].mxu1 }
 0x27e   : > { %v2028_v23 = vadd.f32 %v3789_v52, %v1963_v19  ;;  %v3829_v22 = vadd.f32 %v3828_v51, %v3827_v61  ;;  %v3792_v59 = vadd.f32 %v3791_v55, %v3790_v5  ;;  %v3830_v10 = vpop.f32.mrb[30].mxu0 }
 0x27f   : > { %v3831_v16 = vpop.f32.mrb[31].mxu0 }
 0x280   : > { %v2031_v32 = vadd.f32 %v3792_v59, %v1966_v15  ;;  %v3832_v6 = vadd.f32 %v3831_v16, %v3830_v10  ;;  %v2093_v26 = vadd.f32 %v3829_v22, %v2028_v23  ;;  %v6469_v16 = vld [vmem:[#allocation16_spill] sm:$0xff] }
 0x282   : > { %v3793_v44 = vpop.f32.mrb[24].mxu1  ;;  %v2096_v12 = vadd.f32 %v3832_v6, %v2031_v32  ;;  %v6470_v32 = vunpack.i.l.bf16 %v6469_v16 }
 0x283   : > { %v3794_v54 = vpop.f32.mrb[25].mxu1 }
 0x284   : > { %v3795_v35 = vadd.f32 %v3794_v54, %v3793_v44  ;;  %v3833_v3 = vpop.f32.mrb[32].mxu0  ;;  %v3796_v9 = vpop.f32.mrb[26].mxu1  ;;  %v6471_v44 = vld [vmem:[#allocation36_spill] sm:$0xff] }
 0x285   : > { %v3834_v58 = vpop.f32.mrb[33].mxu0  ;;  %v3797_v46 = vpop.f32.mrb[27].mxu1 }
 0x286   : > { %v2036_v60 = vadd.f32 %v3795_v35, %v1971_v21  ;;  %v3835_v24 = vadd.f32 %v3834_v58, %v3833_v3  ;;  %v3798_v17 = vadd.f32 %v3797_v46, %v3796_v9  ;;  %v3836_v56 = vpop.f32.mrb[34].mxu0  ;;  %v6474_v58 = vunpack.i.l.bf16 %v6471_v44 }
 0x287   : > { %v3837_v19 = vpop.f32.mrb[35].mxu0 }
 0x288   : > { %v2039_v50 = vadd.f32 %v3798_v17, %v1974_v18  ;;  %v3838_v29 = vadd.f32 %v3837_v19, %v3836_v56  ;;  %v2101_v39 = vadd.f32 %v3835_v24, %v2036_v60  ;;  %v6476_v19 = vunpack.i.l.bf16 %v5082_v48  ;;  %v6521_v60 = vld [vmem:[#allocation35_spill] sm:$0xff] }
 0x28a   : > { %v3799_v28 = vpop.f32.mrb[28].mxu1  ;;  %v2104_v15 = vadd.f32 %v3838_v29, %v2039_v50 }
 0x28b   : > { %v3800_v34 = vpop.f32.mrb[29].mxu1 }
 0x28c   : > { %v3801_v62 = vadd.f32 %v3800_v34, %v3799_v28  ;;  %v3839_v40 = vpop.f32.mrb[36].mxu0  ;;  %v3802_v8 = vpop.f32.mrb[30].mxu1 }
 0x28d   : > { %v3840_v42 = vpop.f32.mrb[37].mxu0  ;;  %v3803_v0 = vpop.f32.mrb[31].mxu1 }
 0x28e   : > { %v2044_v14 = vadd.f32 %v3801_v62, %v1979_v33  ;;  %v3841_v4 = vadd.f32 %v3840_v42, %v3839_v40  ;;  %v3804_v13 = vadd.f32 %v3803_v0, %v3802_v8  ;;  %v3842_v1 = vpop.f32.mrb[38].mxu0  ;;  %v6464_v33 = vld [vmem:[#allocation9_spill] sm:$0xff] }
 0x28f   : > { %v3843_v21 = vpop.f32.mrb[39].mxu0  ;;  %v6465_v52 = vunpack.i.h.bf16 %v6464_v33  ;;  %v6473_v3 = vunpack.i.l.bf16 %v6464_v33  ;;  %v6477_v0 = vld [vmem:[#allocation13_spill] sm:$0xff] }
 0x290   : > { %v2047_v31 = vadd.f32 %v3804_v13, %v1982_v37  ;;  %v3844_v7 = vadd.f32 %v3843_v21, %v3842_v1  ;;  %v2109_v2 = vadd.f32 %v3841_v4, %v2044_v14  ;;  %v6478_v14 = vunpack.i.h.bf16 %v6477_v0  ;;  %v6479_v13 = vld [vmem:[#allocation34_spill] sm:$0xff]  ;;  %v6480_v21 = vld [vmem:[#allocation19_spill] sm:$0xff] }
 0x292   : > { %v4083_v38 = vpop.f32.mrb[32].mxu1  ;;  %v2112_v18 = vadd.f32 %v3844_v7, %v2047_v31 }
 0x293   : > { %v5690_v53 = vadd.f32 %v4083_v38, %v2093_v26  ;;  %v2149_v11 = vpop.f32.mrb[33].mxu1 }
 0x294   : > { %v5692_v49 = vadd.f32 %v2149_v11, %v2085_v41  ;;  %v4084_v27 = vpop.f32.mrb[34].mxu1  ;;  %v6467_v41 = vld [vmem:[#allocation11_spill] sm:$0xff] }
 0x295   : > { %v5694_v63 = vadd.f32 %v4084_v27, %v2096_v12  ;;  %v2152_v36 = vpop.f32.mrb[35].mxu1  ;;  %v5699_v61 = vmul.f32 %v6465_v52, %v5690_v53  ;;  %v2182_v37 = vrot.slane %v5690_v53, 7  ;;  %v2222_v5 = vrot.slane %v5690_v53, 1  ;;  %v6481_v11 = vld [vmem:[#allocation23_spill] sm:$0xff]  ;;  %v6484_v52 = vld [vmem:[#allocation38_spill] sm:$0xff] }
 0x296   : > { %v2180_v51 = vrot.slane %v5692_v49, 7  ;;  %v2220_v55 = vrot.slane %v5692_v49, 1  ;;  %v5705_v23 = vadd.f32 %v2152_v36, %v2088_v30  ;;  %v6468_v22 = vunpack.i.h.bf16 %v6467_v41 }
 0x297   : > { %v2183_v10 = vrot.slane %v5694_v63, 7  ;;  %v5714_v6 = vmul.f32 %v6470_v32, %v5694_v63  ;;  %v2223_v26 = vrot.slane %v5694_v63, 1  ;;  %v6472_v12 = vunpack.i.h.bf16 %v6471_v44 }
 0x298   : > { %6466 = vst [vmem:[#allocation56_spill] sm:$0xff] %v5705_v23  ;;  %v2209_v59 = vmul.f32 %v6468_v22, %v5692_v49  ;;  %v2221_v30 = vrot.slane %v5705_v23, 1  ;;  %v2181_v35 = vrot.slane %v5705_v23, 7  ;;  %v5727_v9 = vmul.f32 %v6473_v3, %v5705_v23 }
 0x299   : > { %v5720_v54 = vmul.f32 %v6472_v12, %v5690_v53  ;;  %v5732_v46 = vmul.f32 %v6474_v58, %v5705_v23  ;;  %v5736_v24 = vsel %vm826_vm1, %v2182_v37, %v2183_v10  ;;  %v5742_v17 = vsel %vm947_vm0, %v2222_v5, %v2223_v26  ;;  %v6486_v12 = vld [vmem:[#allocation12_spill] sm:$0xff] }
 0x29a   : > { %v5749_v50 = vmul.f32 %v6476_v19, %v5694_v63  ;;  %v4087_v29 = vpop.f32.mrb[36].mxu1  ;;  %v2194_v28 = vsel %vm826_vm1, %v2180_v51, %v2181_v35  ;;  %v2217_v34 = vpack.c.bf16 %v5699_v61, %v5727_v9  ;;  %v5757_v62 = vsel %vm947_vm0, %v2220_v55, %v2221_v30 }
 0x29b   : > { %v2193_v40 = vsel %vm826_vm1, %v2181_v35, %v2182_v37  ;;  %v5761_v8 = vadd.f32 %v4087_v29, %v2109_v2  ;;  %v2165_v42 = vpop.f32.mrb[37].mxu1  ;;  %v2249_v4 = vmul.f32 %v6478_v14, %v2194_v28  ;;  %v5766_v1 = vmul.f32 %v2194_v28, %v6479_v13  ;;  %v6489_v14 = vld [vmem:[#allocation20_spill] sm:$0xff] }
 0x29c   : > { %v2237_v31 = vmul.f32 %v5757_v62, %v6480_v21  ;;  %v5770_v7 = vadd.f32 %v2165_v42, %v2101_v39  ;;  %v4088_v38 = vpop.f32.mrb[38].mxu1  ;;  %v6482_v27 = vunpack.i.l.bf16 %v6481_v11  ;;  %v6483_v2 = vunpack.i.h.bf16 %v6481_v11  ;;  %v6485_v39 = vld [vmem:[#allocation17_spill] sm:$0xff] }
 0x29d   : > { %v5782_v61 = vmul.f32 %v2193_v40, %v6484_v52  ;;  %v2186_v37 = vrot.slane %v5761_v8, 7  ;;  %v5785_v22 = vadd.f32 %v4088_v38, %v2112_v18  ;;  %v2168_v32 = vpop.f32.mrb[39].mxu1  ;;  %v5788_v44 = vmul.f32 %v2194_v28, %v6485_v39  ;;  %v6494_v39 = vld [vmem:[#allocation14_spill] sm:$0xff] }
 0x29e   : > { %v5774_v36 = vmul.f32 %v6482_v27, %v2193_v40  ;;  %v5779_v33 = vmul.f32 %v6483_v2, %v5736_v24  ;;  %v5791_v35 = vmul.f32 %v2193_v40, %v6486_v12  ;;  %v5793_v3 = vadd.f32 %v2168_v32, %v2104_v15  ;;  %v4381_v12 = vld [vmem:[#allocation4 + $0x100] sm:$0xff]  }
 0x29f   : > { %v6487_v58 = vunpack.i.h.bf16 %v6469_v16  ;;  %v5804_v18 = vsel %vm947_vm0, %v2221_v30, %v2222_v5  ;;  %v2187_v29 = vrot.slane %v5785_v22, 7  ;;  %v6314_v28 = vrot.slane %v5785_v22, 1  ;;  %v6490_v5 = vld [vmem:[#allocation25_spill] sm:$0xff]  ;;  %v4388_v16 = vld [vmem:[#allocation4 + $0x150] sm:$0xff]  }
 0x2a0   : > { %v2257_v9 = vpack.c.bf16 %v5779_v33, %v5774_v36  ;;  %v6488_v15 = vunpack.i.l.bf16 %v6467_v41  ;;  %v5817_v13 = vmul.f32 %v5804_v18, %v6489_v14  ;;  %v5821_v30 = vmul.f32 %v5742_v17, %v6490_v5  ;;  %v6491_v36 = vld [vmem:[#allocation15_spill] sm:$0xff]  ;;  %v6492_v33 = vld [vmem:[#allocation10_spill] sm:$0xff] }
 0x2a1   : > { %v5800_v19 = vmul.f32 %v6487_v58, %v5770_v7  ;;  %v2184_v21 = vrot.slane %v5770_v7, 7  ;;  %v5826_v41 = vsel %vm826_vm1, %v2186_v37, %v2187_v29  ;;  %v5830_v11 = vsel %vm826_vm1, %v2187_v29, %v2180_v51 }
 0x2a2   : > { %v2208_v40 = vmul.f32 %v6488_v15, %v5785_v22  ;;  %v5836_v27 = vsel %vm947_vm0, %v6314_v28, %v2220_v55  ;;  %v2196_v2 = vmul.f32 %v5826_v41, %v6491_v36  ;;  %v6493_v52 = vunpack.i.l.bf16 %v6477_v0  ;;  %v6495_v15 = vld [vmem:[#allocation21_spill] sm:$0xff]  ;;  %v4384_v36 = vld [vmem:[#allocation4 + $0x148] sm:$0xff]  }
 0x2a3   : > { %v2236_v51 = vmul.f32 %v5836_v27, %v6494_v39  ;;  %v2185_v55 = vrot.slane %v5793_v3, 7  ;;  %v5852_v29 = vsel %vm826_vm1, %v2183_v10, %v2184_v21  ;;  %v4383_v39 = vld [vmem:[#allocation4 + $0x180] sm:$0xff]   ;;  %v6498_v10 = vld [vmem:[#allocation18_spill] sm:$0xff] }
 0x2a4   : > { %v2216_v38 = vpack.c.bf16 %v2209_v59, %v2208_v40  ;;  %v2197_v59 = vmul.f32 %v5830_v11, %v6492_v33  ;;  %v2248_v32 = vmul.f32 %v6493_v52, %v5830_v11  ;;  %v5856_v40 = vmul.f32 %v5736_v24, %v6495_v15  ;;  %v6499_v15 = vld [vmem:[#allocation22_spill] sm:$0xff]  ;;  %v6510_v28 = vld [vmem:[#allocation49_spill] sm:$0xff] }
 0x2a5   : > { %v2244_v5 = vpack.c.bf16 %v2237_v31, %v2236_v51  ;;  %v5865_v56 = vsel %vm826_vm1, %v2184_v21, %v2185_v55  ;;  %v5869_v58 = vmul.f32 %v5852_v29, %v6498_v10  ;;  %v6501_v31 = vunpack.i.h.bf16 %v6499_v15 }
 0x2a6   : > { %2927 = vmatprep.mubr.bf16.mxu0 %v2216_v38  ;;  %v2204_v0 = vpack.c.bf16 %v2197_v59, %v2196_v2  ;;  %v2256_v14 = vpack.c.bf16 %v2249_v4, %v2248_v32  ;;  %v6496_v38 = vld [vmem:[#allocation29_spill] sm:$0xff]  ;;  %v6500_v2 = vunpack.i.l.bf16 %v6499_v15  ;;  %v4386_v32 = vld [vmem:[#allocation4 + $0x1c8] sm:$0xff]   ;;  %v2225_v10 = vrot.slane %v5793_v3, 1 }
 0x2a7   : > { %v6497_v33 = vunpack.i.l.bf16 %v6496_v38  ;;  %v5879_v59 = vmul.f32 %v6501_v31, %v5761_v8  ;;  %v6502_v21 = vunpack.i.h.bf16 %v6496_v38  ;;  %v4385_v15 = vld [vmem:[#allocation4 + $0x108] sm:$0xff]   ;;  %v6503_v38 = vld [vmem:[#allocation33_spill] sm:$0xff] }
 0x2a8   : > { %v5874_v4 = vmul.f32 %v6500_v2, %v5793_v3  ;;  %2928 = vmatmul.mubr.bf16.vlgmr.msra.gmra.mrb[40].mxu0 %v2204_v0  ;;  %2992 = vmatprep.mubr.bf16.mxu1 %v2256_v14  ;;  %v5890_v2 = vsel %vm826_vm1, %v2185_v55, %v2186_v37  ;;  %v6504_v31 = vunpack.i.l.bf16 %v6503_v38  ;;  %v4387_v55 = vld [vmem:[#allocation4 + $0x188] sm:$0xff]   ;;  %v6509_v0 = vld [vmem:[#allocation44_spill] sm:$0xff] }
 0x2a9   : > { %v5861_v52 = vmul.f32 %v6497_v33, %v5852_v29  ;;  %v5884_v51 = vmul.f32 %v6502_v21, %v5865_v56  ;;  %v2224_v33 = vrot.slane %v5770_v7, 1  ;;  %3938 = vmatpush3.bf16.msra.mxu0 %v4381_v12  ;;  %2935 = vmatprep.mubr.bf16.mxu0 %v2217_v34  ;;  %v6505_v14 = vld [vmem:[#allocation26_spill] sm:$0xff] }
 0x2aa   : > { %v5899_v21 = vmul.f32 %v6504_v31, %v5890_v2  ;;  %2993 = vmatmul.mubr.bf16.vlgmr.msra.gmra.mrb[40].mxu1 %v2244_v5  ;;  %3939 = vmatprep.subr.bf16.mxu0 %v4384_v36  ;;  %v6507_v5 = vld [vmem:[#allocation31_spill] sm:$0xff] }
 0x2ab   : > { %v2258_v37 = vpack.c.bf16 %v5884_v51, %v5861_v52  ;;  %v2230_v34 = vsel %vm947_vm0, %v2224_v33, %v2225_v10  ;;  %v2231_v12 = vsel %vm947_vm0, %v2223_v26, %v2224_v33  ;;  %3000 = vmatprep.mubr.bf16.mxu1 %v2257_v9  ;;  %3978 = vmatpush3.bf16.msra.mxu1 %v4383_v39  ;;  %v2226_v52 = vrot.slane %v5761_v8, 1  ;;  %v4390_v51 = vld [vmem:[#allocation4 + $0x1d0] sm:$0xff]  }
 0x2ac   : > { %v5910_v31 = vmul.f32 %v2231_v12, %v6505_v14  ;;  %v5913_v36 = vmul.f32 %v2230_v34, %v6507_v5  ;;  %v5916_v42 = vmul.f32 %v2231_v12, %v6509_v0  ;;  %3979 = vmatprep.subr.bf16.mxu1 %v4386_v32  ;;  %v5920_v23 = vmul.f32 %v2230_v34, %v6510_v28  ;;  %v6513_v39 = vld [vmem:[#allocation27_spill] sm:$0xff]  ;;  %v6515_v14 = vld [vmem:[#allocation24_spill] sm:$0xff] }
 0x2ad   : > { %v6512_v26 = vunpack.i.h.bf16 %v6503_v38  ;;  %v5929_v33 = vmul.f32 %v5865_v56, %v6513_v39  ;;  %v5933_v0 = vmul.f32 %v5890_v2, %v6515_v14  ;;  %3940 = vmatpush3.bf16.msra.mxu0 %v4385_v15  ;;  %v4389_v5 = vld [vmem:[#allocation4 + $0x110] sm:$0xff]   ;;  %v6517_v28 = vrot.slane %v5785_v22, 1  ;;  %v6518_v39 = vld [vmem:[#allocation28_spill] sm:$0xff] }
 0x2ae   : > { %6506 = vst [vmem:[#allocation57_spill] sm:$0xff] %v5910_v31  ;;  %6508 = vst [vmem:[#allocation51_spill] sm:$0xff] %v5913_v36  ;;  %3941 = vmatprep.subr.bf16.mxu0 %v4388_v16  ;;  %v4392_v15 = vld [vmem:[#allocation4 + $0x158] sm:$0xff]   ;;  %v6520_v36 = vld [vmem:[#allocation30_spill] sm:$0xff]  ;;  %v6523_v31 = vunpack.i.l.bf16 %v6418_v45 }
 0x2af   : > { %6511 = vst [vmem:[#allocation53_spill] sm:$0xff] %v5920_v23  ;;  %v5925_v9 = vmul.f32 %v6512_v26, %v5826_v41  ;;  %6514 = vst [vmem:[#allocation32_spill] sm:$0xff] %v5929_v33  ;;  %v5941_v38 = vsel %vm947_vm0, %v2226_v52, %v6517_v28  ;;  %v5945_v26 = vsel %vm947_vm0, %v2225_v10, %v2226_v52  ;;  %v6519_v23 = vunpack.i.l.bf16 %v6518_v39  ;;  %v4391_v52 = vld [vmem:[#allocation4 + $0x190] sm:$0xff]  }
 0x2b0   : > { %6516 = vst [vmem:[#allocation60_spill] sm:$0xff] %v5933_v0  ;;  %v5958_v28 = vmul.f32 %v5945_v26, %v6520_v36  ;;  %v5962_v10 = vmul.f32 %v5941_v38, %v6521_v60  ;;  %3980 = vmatpush3.bf16.msra.mxu1 %v4387_v55  ;;  %v5974_v33 = vmul.f32 %v6523_v31, %v5742_v17  ;;  %v6524_v36 = vunpack.i.h.bf16 %v6418_v45 }
 0x2b1   : > { %v5950_v14 = vmul.f32 %v6519_v23, %v5757_v62  ;;  %v6522_v23 = vunpack.i.h.bf16 %v6518_v39  ;;  %v6525_v55 = vpack.c.bf16 %v5791_v35, %v5788_v44  ;;  %3981 = vmatprep.subr.bf16.mxu1 %v4390_v51  ;;  %v4394_v39 = vld [vmem:[#allocation4 + $0x1d8] sm:$0xff]   ;;  %v6526_v31 = vunpack.i.h.bf16 %v5082_v48  ;;  %3942 = vmatpush3.bf16.msra.mxu0 %v4389_v5  ;;  %v4396_v5 = vld [vmem:[#allocation4 + $0x160] sm:$0xff]  }
 0x2b2   : > { %v5978_v0 = vmul.f32 %v6524_v36, %v2231_v12  ;;  %v2247_v60 = vpack.c.bf16 %v5962_v10, %v5958_v28  ;;  %v6527_v45 = vpack.c.bf16 %v5800_v19, %v5714_v6  ;;  %v4393_v44 = vld [vmem:[#allocation4 + $0x118] sm:$0xff]   ;;  %v6528_v48 = vpack.c.bf16 %v5821_v30, %v5817_v13  ;;  %3943 = vmatprep.subr.bf16.mxu0 %v4392_v15  ;;  %v6531_v51 = vld [vmem:[#allocation37_spill] sm:$0xff]  ;;  %v6544_v6 = vld [vmem:[#allocation47_spill] sm:$0xff] }
 0x2b3   : > { %v5967_v16 = vmul.f32 %v6522_v23, %v5804_v18  ;;  %2936 = vmatmul.mubr.bf16.gmra.mrb[44].mxu0 %v6525_v55  ;;  %v2284_v23 = vpack.c.bf16 %v5782_v61, %v5766_v1  ;;  %v5990_v32 = vmul.f32 %v6526_v31, %v5770_v7  ;;  %v6529_v19 = vunpack.i.l.bf16 %v5072_v43  ;;  %v6532_v30 = vld [vmem:[#allocation40_spill] sm:$0xff]  ;;  %v4416_v61 = vld [vmem:[#allocation4 + $0x220] sm:$0xff]   ;;  %v4418_v10 = vld [vmem:[#allocation4 + $0x230] sm:$0xff]  }
 0x2b4   : > { %2943 = vmatprep.mubr.bf16.mxu0 %v6527_v45  ;;  %v2273_v12 = vpack.c.bf16 %v5978_v0, %v5974_v33  ;;  %3001 = vmatmul.mubr.bf16.gmra.mrb[44].mxu1 %v6528_v48  ;;  %v6530_v55 = vunpack.i.h.bf16 %v5072_v43  ;;  %v4395_v45 = vld [vmem:[#allocation4 + $0x198] sm:$0xff]   ;;  %v6017_v13 = vmul.f32 %v5736_v24, %v6531_v51  ;;  %v6021_v15 = vmul.f32 %v5852_v29, %v6532_v30  ;;  %v6533_v48 = vld [vmem:[#allocation42_spill] sm:$0xff]  ;;  %v4398_v43 = vld [vmem:[#allocation4 + $0x1e0] sm:$0xff]  }
 0x2b5   : > { %v2272_v35 = vpack.c.bf16 %v5967_v16, %v5950_v14  ;;  %v6008_v36 = vmul.f32 %v6529_v19, %v2230_v34  ;;  %3008 = vmatprep.mubr.bf16.mxu1 %v2258_v37  ;;  %3982 = vmatpush3.bf16.msra.mxu1 %v4391_v52  ;;  %v6534_v34 = vunpack.i.l.bf16 %v6533_v48  ;;  %v6535_v52 = vunpack.i.h.bf16 %v6533_v48  ;;  %v4397_v30 = vld [vmem:[#allocation4 + $0x120] sm:$0xff]   ;;  %v6559_v14 = vld [vmem:[#allocation56_spill] sm:$0xff]  ;;  %v4417_v0 = vld [vmem:[#allocation4 + $0x228] sm:$0xff]  }
 0x2b6   : > { %v6013_v31 = vmul.f32 %v6530_v55, %v5945_v26  ;;  %3983 = vmatprep.subr.bf16.mxu1 %v4394_v39  ;;  %v6536_v29 = vunpack.i.l.bf16 %v5080_v47  ;;  %3944 = vmatpush3.bf16.msra.mxu0 %v4393_v44  ;;  %v6051_v48 = vmul.f32 %v5865_v56, %v6436_v57  ;;  %v6538_v24 = vunpack.i.l.bf16 %v6429_v20  ;;  %v6541_v44 = vld [vmem:[#allocation48_spill] sm:$0xff]  ;;  %v6543_v56 = vld [vmem:[#allocation41_spill] sm:$0xff] }
 0x2b7   : > { %v6026_v19 = vmul.f32 %v6534_v34, %v5793_v3  ;;  %v6033_v55 = vmul.f32 %v6535_v52, %v5761_v8  ;;  %v6537_v34 = vunpack.i.h.bf16 %v5080_v47  ;;  %v6055_v52 = vmul.f32 %v5890_v2, %v6437_v25  ;;  %3945 = vmatprep.subr.bf16.mxu0 %v4396_v5  ;;  %v4399_v25 = vld [vmem:[#allocation4 + $0x1a0] sm:$0xff]   ;;  %v6540_v5 = vld [vmem:[#allocation55_spill] sm:$0xff]  ;;  %v4415_v28 = vld [vmem:[#allocation4 + $0x218] sm:$0xff]  }
 0x2b8   : > { %v6040_v51 = vmul.f32 %v6536_v29, %v5941_v38  ;;  %v4400_v29 = vld [vmem:[#allocation4 + $0x168] sm:$0xff]   ;;  %v6062_v39 = vmul.f32 %v6538_v24, %v5785_v22  ;;  %v6539_v47 = vunpack.i.h.bf16 %v6429_v20  ;;  %v6077_v24 = vmul.f32 %v5826_v41, %v6540_v5 }
 0x2b9   : > { %v6047_v37 = vmul.f32 %v6537_v34, %v5836_v27  ;;  %3984 = vmatpush3.bf16.msra.mxu1 %v4395_v45  ;;  %v6081_v20 = vmul.f32 %v5830_v11, %v6541_v44  ;;  %v4402_v45 = vld [vmem:[#allocation4 + $0x1e8] sm:$0xff]   ;;  %v6090_v2 = vmul.f32 %v5804_v18, %v6543_v56  ;;  %v6094_v41 = vmul.f32 %v5742_v17, %v6544_v6  ;;  %v6548_v56 = vld [vmem:[#allocation51_spill] sm:$0xff] }
 0x2ba   : > { %v6067_v34 = vmul.f32 %v6539_v47, %v5692_v49  ;;  %v6542_v47 = vpack.c.bf16 %v5869_v58, %v5856_v40  ;;  %3985 = vmatprep.subr.bf16.mxu1 %v4398_v43  ;;  %3946 = vmatpush3.bf16.msra.mxu0 %v4397_v30  ;;  %v6545_v11 = vpack.c.bf16 %v5879_v59, %v5874_v4  ;;  %v4401_v58 = vld [vmem:[#allocation4 + $0x128] sm:$0xff]   ;;  %v6546_v43 = vld [vmem:[#allocation53_spill] sm:$0xff]  ;;  %v4404_v6 = vld [vmem:[#allocation4 + $0x170] sm:$0xff]  }
 0x2bb   : > { %v2287_v40 = vpack.c.bf16 %v6081_v20, %v6077_v24  ;;  %v6547_v5 = vld [vmem:[#allocation62_spill] sm:$0xff]  ;;  %3947 = vmatprep.subr.bf16.mxu0 %v4400_v29  ;;  %v2308_v4 = vpack.c.bf16 %v6094_v41, %v6090_v2  ;;  %v6551_v59 = vld [vmem:[#allocation52_spill] sm:$0xff]  ;;  %v6560_v16 = vpack.c.bf16 %v6559_v14, %v5692_v49  ;;  %v6562_v49 = vpack.c.bf16 %v5694_v63, %v5690_v53 }
 0x2bc   : > { %2944 = vmatmul.mubr.bf16.gmra.mrb[48].mxu0 %v6542_v47  ;;  %v2299_v57 = vpack.c.bf16 %v6067_v34, %v6062_v39  ;;  %v6105_v18 = vmul.f32 %v5945_v26, %v6547_v5  ;;  %v6549_v47 = vld [vmem:[#allocation57_spill] sm:$0xff]  ;;  %v6114_v30 = vmul.f32 %v5941_v38, %v6551_v59  ;;  %v6553_v26 = vpack.c.bf16 %v5925_v9, %v5899_v21  ;;  %v4403_v5 = vld [vmem:[#allocation4 + $0x1a8] sm:$0xff]   ;;  %v4408_v59 = vld [vmem:[#allocation4 + $0x178] sm:$0xff]  }
 0x2bd   : > { %2951 = vmatprep.mubr.bf16.mxu0 %v6545_v11  ;;  %v6550_v17 = vpack.c.bf16 %v6548_v56, %v6549_v47  ;;  %v6552_v11 = vld [vmem:[#allocation63_spill] sm:$0xff]  ;;  %3986 = vmatpush3.bf16.msra.mxu1 %v4399_v25  ;;  %v6555_v9 = vld [vmem:[#allocation60_spill] sm:$0xff]  ;;  %v6563_v33 = vpack.c.bf16 %v6013_v31, %v6008_v36  ;;  %v6564_v1 = vpack.c.bf16 %v6021_v15, %v6017_v13  ;;  %v3587_v15 = vld [vmem:[%s6234_s6] ss:$0 sm:$0xff] }
 0x2be   : > { %v6118_v44 = vmul.f32 %v5836_v27, %v6552_v11  ;;  %v6554_v56 = vld [vmem:[#allocation59_spill] sm:$0xff]  ;;  %3987 = vmatprep.subr.bf16.mxu1 %v4402_v45  ;;  %v2310_v38 = vpack.c.bf16 %v6114_v30, %v6105_v18  ;;  %3948 = vmatpush3.bf16.msra.mxu0 %v4401_v58  ;;  %v6556_v25 = vld [vmem:[#allocation32_spill] sm:$0xff]  ;;  %v4412_v58 = vld [vmem:[#allocation4 + $0x200] sm:$0xff]   ;;  %v6566_v53 = vpack.c.bf16 %v5793_v3, %v5770_v7 }
 0x2bf   : > { %3009 = vmatmul.mubr.bf16.gmra.mrb[48].mxu1 %v6550_v17  ;;  %v6125_v29 = vmul.f32 %v5757_v62, %v6554_v56  ;;  %v4406_v47 = vld [vmem:[#allocation4 + $0x1f0] sm:$0xff]   ;;  %3949 = vmatprep.subr.bf16.mxu0 %v4404_v6  ;;  %v6557_v11 = vpack.c.bf16 %v6555_v9, %v6556_v25  ;;  %v4410_v62 = vld [vmem:[#allocation4 + $0x1f8] sm:$0xff]   ;;  %v4413_v6 = vld [vmem:[#allocation4 + $0x208] sm:$0xff]   ;;  %v6567_v63 = vpack.c.bf16 %v6047_v37, %v6040_v51 }
 0x2c0   : > { %3016 = vmatprep.mubr.bf16.mxu1 %v6553_v26  ;;  %v4405_v17 = vld [vmem:[#allocation4 + $0x130] sm:$0xff]   ;;  %v4409_v45 = vld [vmem:[#allocation4 + $0x138] sm:$0xff]   ;;  %v6569_v7 = vpack.c.bf16 %v5785_v22, %v5761_v8  ;;  %v6570_v3 = vpack.c.bf16 %v6546_v43, %v5916_v42  ;;  %v4420_v8 = vld [vmem:[%s6235_s7] sm:$0xff]  }
 0x2c1   : > { %v2311_v27 = vpack.c.bf16 %v6125_v29, %v6118_v44  ;;  %3988 = vmatpush3.bf16.msra.mxu1 %v4403_v5  ;;  %v4407_v21 = vld [vmem:[#allocation4 + $0x1b0] sm:$0xff]   ;;  %v6558_v44 = vpack.c.bf16 %v5720_v54, %v5732_v46  ;;  %v4411_v18 = vld [vmem:[#allocation4 + $0x1b8] sm:$0xff]   ;;  %v6561_v46 = vpack.c.bf16 %v5990_v32, %v5749_v50  ;;  %v6565_v50 = vpack.c.bf16 %v6033_v55, %v6026_v19  ;;  %v4421_v22 = vld [vmem:[%s6235_s7 + $0x8] sm:$0xff]  }
 0x2c2   : > { %3989 = vmatprep.subr.bf16.mxu1 %v4406_v47  ;;  %3950 = vmatpush3.bf16.msra.mxu0 %v4405_v17  ;;  %v4414_v54 = vld [vmem:[#allocation4 + $0x210] sm:$0xff]   ;;  %v6568_v32 = vpack.c.bf16 %v6055_v52, %v6051_v48  ;;  %v4423_v42 = vld [vmem:[%s6235_s7 + $0x18] sm:$0xff]  }
 0x2c3   : > { %3951 = vmatprep.subr.bf16.mxu0 %v4408_v59  ;;  %v4426_v36 = vld [vmem:[%s6235_s7 + $0x30] sm:$0xff]   ;;  %v4427_v31 = vld [vmem:[%s6235_s7 + $0x38] sm:$0xff]  }
 0x2c4   : > { %2952 = vmatmul.mubr.bf16.gmra.mrb[52].mxu0 %v6557_v11 }
 0x2c5   : > { %3057 = vmatprep.mubr.bf16.mxu0 %v2272_v35  ;;  %3990 = vmatpush3.bf16.msra.mxu1 %v4407_v21  ;;  %v4424_v35 = vld [vmem:[%s6235_s7 + $0x20] sm:$0xff]  }
 0x2c6   : > { %3991 = vmatprep.subr.bf16.mxu1 %v4410_v62  ;;  %3952 = vmatpush3.bf16.msra.mxu0 %v4409_v45 }
 0x2c7   : > { %3017 = vmatmul.mubr.bf16.gmra.mrb[52].mxu1 %v2247_v60  ;;  %4089 = vmatprep.subr.bf16.mxu0 %v4412_v58  ;;  %v4419_v60 = vld [vmem:[#allocation4 + $0x238] sm:$0xff]  }
 0x2c8   : > { %3122 = vmatprep.mubr.bf16.mxu1 %v6558_v44 }
 0x2c9   : > { %3992 = vmatpush3.bf16.msra.mxu1 %v4411_v18 }
 0x2ca   : > { %4113 = vmatprep.subr.bf16.mxu1 %v4420_v8 }
 0x2cc   : > { %3058 = vmatmul.mubr.bf16.vlgmr.msra.gmra.mrb[56].mxu0 %v6560_v16 }
 0x2cd   : > { %4090 = vmatpush3.bf16.msra.mxu0 %v4412_v58  ;;  %3065 = vmatprep.mubr.bf16.mxu0 %v2273_v12  ;;  %v4425_v12 = vld [vmem:[%s6235_s7 + $0x28] sm:$0xff]  }
 0x2ce   : > { %4091 = vmatprep.subr.bf16.mxu0 %v4413_v6 }
 0x2cf   : > { %3123 = vmatmul.mubr.bf16.vlgmr.msra.gmra.mrb[56].mxu1 %v2284_v23  ;;  %v4422_v23 = vld [vmem:[%s6235_s7 + $0x10] sm:$0xff]  }
 0x2d0   : > { %3130 = vmatprep.mubr.bf16.mxu1 %v6561_v46  ;;  %4114 = vmatpush3.bf16.msra.mxu1 %v4420_v8 }
 0x2d1   : > { %4092 = vmatpush3.bf16.msra.mxu0 %v4413_v6  ;;  %4115 = vmatprep.subr.bf16.mxu1 %v4421_v22 }
 0x2d2   : > { %4093 = vmatprep.subr.bf16.mxu0 %v4414_v54 }
 0x2d4   : > { %3066 = vmatmul.mubr.bf16.gmra.mrb[60].mxu0 %v6562_v49  ;;  %4116 = vmatpush3.bf16.msra.mxu1 %v4421_v22 }
 0x2d5   : > { %4094 = vmatpush3.bf16.msra.mxu0 %v4414_v54  ;;  %3073 = vmatprep.mubr.bf16.mxu0 %v6563_v33 }
 0x2d6   : > { %4095 = vmatprep.subr.bf16.mxu0 %v4415_v28  ;;  %4117 = vmatprep.subr.bf16.mxu1 %v4422_v23 }
 0x2d7   : > { %3131 = vmatmul.mubr.bf16.gmra.mrb[60].mxu1 %v6564_v1 }
 0x2d8   : > { %3138 = vmatprep.mubr.bf16.mxu1 %v6565_v50  ;;  %4118 = vmatpush3.bf16.msra.mxu1 %v4422_v23 }
 0x2d9   : > { %4096 = vmatpush3.bf16.msra.mxu0 %v4415_v28  ;;  %4119 = vmatprep.subr.bf16.mxu1 %v4423_v42 }
 0x2da   : > { %4097 = vmatprep.subr.bf16.mxu0 %v4416_v61 }
 0x2dc   : > { %3074 = vmatmul.mubr.bf16.gmra.mrb[64].mxu0 %v6566_v53  ;;  %4120 = vmatpush3.bf16.msra.mxu1 %v4423_v42 }
 0x2dd   : > { %4098 = vmatpush3.bf16.msra.mxu0 %v4416_v61  ;;  %3081 = vmatprep.mubr.bf16.mxu0 %v6567_v63 }
 0x2de   : > { %4099 = vmatprep.subr.bf16.mxu0 %v4417_v0  ;;  %4121 = vmatprep.subr.bf16.mxu1 %v4424_v35 }
 0x2df   : > { %3139 = vmatmul.mubr.bf16.gmra.mrb[64].mxu1 %v6568_v32 }
 0x2e0   : > { %3146 = vmatprep.mubr.bf16.mxu1 %v2299_v57  ;;  %4122 = vmatpush3.bf16.msra.mxu1 %v4424_v35 }
 0x2e1   : > { %4100 = vmatpush3.bf16.msra.mxu0 %v4417_v0  ;;  %4123 = vmatprep.subr.bf16.mxu1 %v4425_v12 }
 0x2e2   : > { %4101 = vmatprep.subr.bf16.mxu0 %v4418_v10 }
 0x2e4   : > { %3082 = vmatmul.mubr.bf16.gmra.mrb[68].mxu0 %v6569_v7  ;;  %4124 = vmatpush3.bf16.msra.mxu1 %v4425_v12 }
 0x2e5   : > { %4102 = vmatpush3.bf16.msra.mxu0 %v4418_v10  ;;  %4105 = vmatprep.mubr.bf16.mxu0 %v2308_v4 }
 0x2e6   : > { %4103 = vmatprep.subr.bf16.mxu0 %v4419_v60  ;;  %4125 = vmatprep.subr.bf16.mxu1 %v4426_v36 }
 0x2e7   : > { %3147 = vmatmul.mubr.bf16.gmra.mrb[68].mxu1 %v2287_v40 }
 0x2e8   : > { %4126 = vmatpush3.bf16.msra.mxu1 %v4426_v36 }
 0x2e9   : > { %4104 = vmatpush3.bf16.msra.mxu0 %v4419_v60  ;;  %4127 = vmatprep.subr.bf16.mxu1 %v4427_v31 }
 0x2ec   : > { %4106 = vmatmul.mubr.bf16.vlgmr.msra.gmra.mrb[72].mxu0 %v6570_v3  ;;  %4128 = vmatpush3.bf16.msra.mxu1 %v4427_v31 }
 0x2ed   : > { %4109 = vmatprep.mubr.bf16.mxu0 %v2310_v38 }
 0x2f4   : > { %4110 = vmatmul.mubr.bf16.gmra.mrb[76].mxu0 %v2311_v27 }
 0x37b   : > { %v3873_v13 = vpop.f32.mrb[40].mxu0 }
 0x37c   : > { %v3874_v19 = vpop.f32.mrb[41].mxu0 }
 0x37d   : > { %v3875_v37 = vadd.f32 %v3874_v19, %v3873_v13  ;;  %v3913_v55 = vpop.f32.mrb[40].mxu1  ;;  %v3876_v51 = vpop.f32.mrb[42].mxu0 }
 0x37e   : > { %v3914_v39 = vpop.f32.mrb[41].mxu1  ;;  %v3877_v48 = vpop.f32.mrb[43].mxu0 }
 0x37f   : > { %v2930_v52 = vadd.f32 %v3875_v37, %v3587_v15  ;;  %v3915_v34 = vadd.f32 %v3914_v39, %v3913_v55  ;;  %v3878_v57 = vadd.f32 %v3877_v48, %v3876_v51  ;;  %v3916_v2 = vpop.f32.mrb[42].mxu1 }
 0x380   : > { %v3917_v24 = vpop.f32.mrb[43].mxu1 }
 0x381   : > { %v2995_v20 = vadd.f32 %v3915_v34, %v2930_v52  ;;  %v2933_v41 = vadd.f32 %v3878_v57, %v3587_v15  ;;  %v3918_v40 = vadd.f32 %v3917_v24, %v3916_v2 }
 0x383   : > { %v2998_v43 = vadd.f32 %v3918_v40, %v2933_v41 }
 0x386   : > { %v3879_v4 = vpop.f32.mrb[44].mxu0 }
 0x387   : > { %v3880_v30 = vpop.f32.mrb[45].mxu0  ;;  %v3919_v5 = vpop.f32.mrb[44].mxu1 }
 0x388   : > { %v3881_v26 = vadd.f32 %v3880_v30, %v3879_v4  ;;  %v3882_v56 = vpop.f32.mrb[46].mxu0  ;;  %v3920_v29 = vpop.f32.mrb[45].mxu1 }
 0x389   : > { %v3883_v47 = vpop.f32.mrb[47].mxu0  ;;  %v3921_v17 = vadd.f32 %v3920_v29, %v3919_v5  ;;  %v3922_v59 = vpop.f32.mrb[46].mxu1 }
 0x38a   : > { %v2938_v38 = vadd.f32 %v3881_v26, %v3587_v15  ;;  %v3884_v27 = vadd.f32 %v3883_v47, %v3882_v56  ;;  %v3923_v21 = vpop.f32.mrb[47].mxu1 }
 0x38b   : > { %v3924_v11 = vadd.f32 %v3923_v21, %v3922_v59 }
 0x38c   : > { %v3003_v9 = vadd.f32 %v3921_v17, %v2938_v38  ;;  %v2941_v25 = vadd.f32 %v3884_v27, %v3587_v15 }
 0x38e   : > { %v3006_v62 = vadd.f32 %v3924_v11, %v2941_v25 }
 0x38f   : > { %v3885_v45 = vpop.f32.mrb[48].mxu0 }
 0x390   : > { %v3886_v58 = vpop.f32.mrb[49].mxu0 }
 0x391   : > { %v3887_v44 = vadd.f32 %v3886_v58, %v3885_v45  ;;  %v3888_v6 = vpop.f32.mrb[50].mxu0 }
 0x392   : > { %v3925_v18 = vpop.f32.mrb[48].mxu1  ;;  %v3889_v16 = vpop.f32.mrb[51].mxu0 }
 0x393   : > { %v3926_v14 = vpop.f32.mrb[49].mxu1  ;;  %v2946_v54 = vadd.f32 %v3887_v44, %v3587_v15  ;;  %v3890_v28 = vadd.f32 %v3889_v16, %v3888_v6 }
 0x394   : > { %v3927_v46 = vadd.f32 %v3926_v14, %v3925_v18  ;;  %v3928_v49 = vpop.f32.mrb[50].mxu1 }
 0x395   : > { %v3929_v33 = vpop.f32.mrb[51].mxu1  ;;  %v2949_v61 = vadd.f32 %v3890_v28, %v3587_v15 }
 0x396   : > { %v3011_v1 = vadd.f32 %v3927_v46, %v2946_v54  ;;  %v3930_v50 = vadd.f32 %v3929_v33, %v3928_v49 }
 0x397   : > { %v3891_v53 = vpop.f32.mrb[52].mxu0 }
 0x398   : > { %v3014_v0 = vadd.f32 %v3930_v50, %v2949_v61  ;;  %v3892_v63 = vpop.f32.mrb[53].mxu0 }
 0x399   : > { %v3893_v32 = vadd.f32 %v3892_v63, %v3891_v53  ;;  %v3894_v60 = vpop.f32.mrb[54].mxu0 }
 0x39a   : > { %v3931_v10 = vpop.f32.mrb[52].mxu1  ;;  %v3895_v3 = vpop.f32.mrb[55].mxu0 }
 0x39b   : > { %v3932_v7 = vpop.f32.mrb[53].mxu1  ;;  %v2954_v8 = vadd.f32 %v3893_v32, %v3587_v15  ;;  %v3896_v23 = vadd.f32 %v3895_v3, %v3894_v60 }
 0x39c   : > { %v3933_v22 = vadd.f32 %v3932_v7, %v3931_v10  ;;  %v3934_v42 = vpop.f32.mrb[54].mxu1 }
 0x39d   : > { %v3935_v35 = vpop.f32.mrb[55].mxu1  ;;  %v2957_v36 = vadd.f32 %v3896_v23, %v3587_v15 }
 0x39e   : > { %v3019_v12 = vadd.f32 %v3933_v22, %v2954_v8  ;;  %v3936_v31 = vadd.f32 %v3935_v35, %v3934_v42 }
 0x39f   : > { %v3953_v19 = vpop.f32.mrb[56].mxu0 }
 0x3a0   : > { %v3022_v13 = vadd.f32 %v3936_v31, %v2957_v36  ;;  %v3954_v37 = vpop.f32.mrb[57].mxu0 }
 0x3a1   : > { %v3955_v55 = vadd.f32 %v3954_v37, %v3953_v19  ;;  %v3956_v39 = vpop.f32.mrb[58].mxu0 }
 0x3a2   : > { %v3993_v51 = vpop.f32.mrb[56].mxu1  ;;  %v3957_v52 = vpop.f32.mrb[59].mxu0 }
 0x3a3   : > { %v3994_v48 = vpop.f32.mrb[57].mxu1  ;;  %v3060_v34 = vadd.f32 %v3955_v55, %v2995_v20  ;;  %v3958_v2 = vadd.f32 %v3957_v52, %v3956_v39 }
 0x3a4   : > { %v3995_v57 = vadd.f32 %v3994_v48, %v3993_v51  ;;  %v3996_v24 = vpop.f32.mrb[58].mxu1 }
 0x3a5   : > { %v3997_v41 = vpop.f32.mrb[59].mxu1  ;;  %v3063_v40 = vadd.f32 %v3958_v2, %v2998_v43 }
 0x3a6   : > { %v3998_v4 = vadd.f32 %v3997_v41, %v3996_v24  ;;  %v3125_v30 = vadd.f32 %v3995_v57, %v3060_v34 }
 0x3a7   : > { %v3959_v26 = vpop.f32.mrb[60].mxu0 }
 0x3a8   : > { %v3128_v5 = vadd.f32 %v3998_v4, %v3063_v40  ;;  %v3960_v15 = vpop.f32.mrb[61].mxu0 }
 0x3a9   : > { %v3961_v56 = vadd.f32 %v3960_v15, %v3959_v26  ;;  %v3962_v47 = vpop.f32.mrb[62].mxu0 }
 0x3aa   : > { %v3999_v29 = vpop.f32.mrb[60].mxu1  ;;  %v3963_v17 = vpop.f32.mrb[63].mxu0 }
 0x3ab   : > { %v4000_v38 = vpop.f32.mrb[61].mxu1  ;;  %v3068_v27 = vadd.f32 %v3961_v56, %v3003_v9  ;;  %v3964_v21 = vadd.f32 %v3963_v17, %v3962_v47 }
 0x3ac   : > { %v4001_v59 = vadd.f32 %v4000_v38, %v3999_v29  ;;  %v4002_v25 = vpop.f32.mrb[62].mxu1 }
 0x3ad   : > { %v4003_v20 = vpop.f32.mrb[63].mxu1  ;;  %v3071_v11 = vadd.f32 %v3964_v21, %v3006_v62 }
 0x3ae   : > { %v4004_v45 = vadd.f32 %v4003_v20, %v4002_v25  ;;  %v3133_v58 = vadd.f32 %v4001_v59, %v3068_v27 }
 0x3af   : > { %v3965_v44 = vpop.f32.mrb[64].mxu0 }
 0x3b0   : > { %v3136_v43 = vadd.f32 %v4004_v45, %v3071_v11  ;;  %v3966_v18 = vpop.f32.mrb[65].mxu0 }
 0x3b1   : > { %v3967_v6 = vadd.f32 %v3966_v18, %v3965_v44  ;;  %v3968_v16 = vpop.f32.mrb[66].mxu0 }
 0x3b2   : > { %v4005_v14 = vpop.f32.mrb[64].mxu1  ;;  %v3969_v46 = vpop.f32.mrb[67].mxu0 }
 0x3b3   : > { %v4006_v54 = vpop.f32.mrb[65].mxu1  ;;  %v3076_v28 = vadd.f32 %v3967_v6, %v3011_v1  ;;  %v3970_v33 = vadd.f32 %v3969_v46, %v3968_v16 }
 0x3b4   : > { %v4007_v49 = vadd.f32 %v4006_v54, %v4005_v14  ;;  %v4008_v61 = vpop.f32.mrb[66].mxu1 }
 0x3b5   : > { %v4009_v9 = vpop.f32.mrb[67].mxu1  ;;  %v3079_v50 = vadd.f32 %v3970_v33, %v3014_v0 }
 0x3b6   : > { %v4010_v53 = vadd.f32 %v4009_v9, %v4008_v61  ;;  %v3141_v63 = vadd.f32 %v4007_v49, %v3076_v28 }
 0x3b7   : > { %v3971_v32 = vpop.f32.mrb[68].mxu0 }
 0x3b8   : > { %v3144_v62 = vadd.f32 %v4010_v53, %v3079_v50  ;;  %v3972_v10 = vpop.f32.mrb[69].mxu0 }
 0x3b9   : > { %v3973_v60 = vadd.f32 %v3972_v10, %v3971_v32  ;;  %v3974_v3 = vpop.f32.mrb[70].mxu0 }
 0x3ba   : > { %v4011_v7 = vpop.f32.mrb[68].mxu1  ;;  %v3975_v22 = vpop.f32.mrb[71].mxu0 }
 0x3bb   : > { %v4012_v8 = vpop.f32.mrb[69].mxu1  ;;  %v3084_v23 = vadd.f32 %v3973_v60, %v3019_v12  ;;  %v3976_v35 = vadd.f32 %v3975_v22, %v3974_v3 }
 0x3bc   : > { %v4013_v42 = vadd.f32 %v4012_v8, %v4011_v7  ;;  %v4014_v36 = vpop.f32.mrb[70].mxu1 }
 0x3bd   : > { %v4015_v1 = vpop.f32.mrb[71].mxu1  ;;  %v3087_v31 = vadd.f32 %v3976_v35, %v3022_v13 }
 0x3be   : > { %v4016_v19 = vadd.f32 %v4015_v1, %v4014_v36  ;;  %v3149_v37 = vadd.f32 %v4013_v42, %v3084_v23 }
 0x3bf   : > { %v4107_v55 = vpop.f32.mrb[72].mxu0 }
 0x3c0   : > { %v3152_v0 = vadd.f32 %v4016_v19, %v3087_v31  ;;  %v3198_v51 = vadd.f32 %v4107_v55, %v3133_v58  ;;  %v3189_v39 = vpop.f32.mrb[73].mxu0 }
 0x3c1   : > { %v3190_v48 = vadd.f32 %v3189_v39, %v3125_v30  ;;  %v4108_v52 = vpop.f32.mrb[74].mxu0  ;;  %v3660_v30 = vld [vmem:[%s6236_s8] ss:$0 sm:$0xff] }
 0x3c2   : > { %v3201_v34 = vadd.f32 %v4108_v52, %v3136_v43  ;;  %v3192_v57 = vpop.f32.mrb[75].mxu0 }
 0x3c3   : > { %v3193_v2 = vadd.f32 %v3192_v57, %v3128_v5 }
 0x3c4   : > { %v3221_v24 = vpack.c.bf16 %v3201_v34, %v3198_v51 }
 0x3c5   : > { %v3220_v41 = vpack.c.bf16 %v3193_v2, %v3190_v48 }
 0x3c7   : > { %v4111_v12 = vpop.f32.mrb[76].mxu0  ;;  %4129 = vmatprep.mubr.bf16.mxu1 %v3220_v41 }
 0x3c8   : > { %v3214_v40 = vadd.f32 %v4111_v12, %v3149_v37  ;;  %v3205_v4 = vpop.f32.mrb[77].mxu0  ;;  %4130 = vmatmul.mubr.bf16.vlgmr.msra.gmra.mrb[72].mxu1 %v3221_v24 }
 0x3c9   : > { %v3206_v13 = vadd.f32 %v3205_v4, %v3141_v63  ;;  %v4112_v26 = vpop.f32.mrb[78].mxu0 }
 0x3ca   : > { %v3217_v15 = vadd.f32 %v4112_v26, %v3152_v0  ;;  %v3208_v56 = vpop.f32.mrb[79].mxu0 }
 0x3cb   : > { %v3209_v29 = vadd.f32 %v3208_v56, %v3144_v62 }
 0x3cc   : > { %v3223_v47 = vpack.c.bf16 %v3217_v15, %v3214_v40 }
 0x3cd   : > { %v3222_v38 = vpack.c.bf16 %v3209_v29, %v3206_v13 }
 0x3cf   : > { %4133 = vmatprep.mubr.bf16.mxu1 %v3222_v38 }
 0x3d0   : > { %4134 = vmatmul.mubr.bf16.gmra.mrb[76].mxu1 %v3223_v47 }
 0x49b   : > { %v4131_v5 = vpop.f32.mrb[72].mxu1 }
 0x49c   : > { %v3338_v17 = vadd.f32 %v4131_v5, %v3660_v30  ;;  %v3329_v27 = vpop.f32.mrb[73].mxu1 }
 0x49d   : > { %v3330_v59 = vadd.f32 %v3660_v30, %v3329_v27  ;;  %v4132_v21 = vpop.f32.mrb[74].mxu1 }
 0x49e   : > { %3362 = vst [vmem:[%s430_s20 + $0x10] sm:$0xff] %v3338_v17  ;;  %v3341_v25 = vadd.f32 %v4132_v21, %v3660_v30  ;;  %v3332_v20 = vpop.f32.mrb[75].mxu1 }
 0x49f   : > { %3360 = vst [vmem:[%s430_s20] sm:$0xff] %v3330_v59  ;;  %v3333_v11 = vadd.f32 %v3660_v30, %v3332_v20 }
 0x4a0   : > { %3363 = vst [vmem:[%s430_s20 + $0x18] sm:$0xff] %v3341_v25 }
 0x4a1   : > { %3361 = vst [vmem:[%s430_s20 + $0x8] sm:$0xff] %v3333_v11 }
 0x4a3   : > { %v4135_v45 = vpop.f32.mrb[76].mxu1 }
 0x4a4   : > { %v3354_v58 = vadd.f32 %v4135_v45, %v3660_v30  ;;  %v3345_v44 = vpop.f32.mrb[77].mxu1 }
 0x4a5   : > { %v3346_v43 = vadd.f32 %v3660_v30, %v3345_v44  ;;  %v4136_v18 = vpop.f32.mrb[78].mxu1 }
 0x4a6   : > { %3366 = vst [vmem:[%s430_s20 + $0x30] sm:$0xff] %v3354_v58  ;;  %v3357_v6 = vadd.f32 %v4136_v18, %v3660_v30  ;;  %v3348_v14 = vpop.f32.mrb[79].mxu1 }
 0x4a7   : > { %3364 = vst [vmem:[%s430_s20 + $0x20] sm:$0xff] %v3346_v43  ;;  %v3349_v16 = vadd.f32 %v3660_v30, %v3348_v14 }
 0x4a8   : > { %3367 = vst [vmem:[%s430_s20 + $0x38] sm:$0xff] %v3357_v6 }
 0x4a9   : > { %3365 = vst [vmem:[%s430_s20 + $0x28] sm:$0xff] %v3349_v16 }
 0x4aa PF: > { %s23_s17 = sadd.s32 1, %s4542_s17  }
 0x4ab   : > { %p20_p2 = scmp.ge.s32.totalorder %s23_s17, 4  }
 0x4ad   :  { %22 = sbr.rel (!%p20_p2) target bundleno = 2 (0x2), region = 107 }
 0x4b4   :  { %3389 = vsyncpa [#allocation3], 1 }
 0x4b5   :  { %3391 = vsyncpa [#allocation3 + $0x1], 1 }
 0x4b6   :  { %3392 = vsyncpa [#allocation5], 1 }

</bundles_post_ra>
